<compile_context>
chip_gen: v7x
topology: tpu7x:2x2x1
jax: 0.10.0
libtpu: 0.0.40
codegen_flags: <defaults>
</compile_context>

<pallas_src>
import functools

import jax
import jax.numpy as jnp
from jax.experimental import pallas as pl
from jax.experimental.pallas import tpu as pltpu


def generator_lstm_kernel(z_ref,                       # (B, L)
                          wih0_ref, whh0_ref, b0_ref,  # layer 0: (L,4H), (H,4H), (1,4H)
                          w1_ref, b1_ref,              # layer 1 fused: (2H,4H), (1,4H)
                          wp_ref, bp_ref,              # projection (temp-scaled): (H,V), (1,V)
                          logits_ref):                 # out: (T, B, V)
    B = z_ref.shape[0]
    H = whh0_ref.shape[0]
    T, _, V = logits_ref.shape

    # Hoist weight loads / broadcasts out of the unrolled loop (JAX does not CSE these).
    whh0 = whh0_ref[...]                                # (H, 4H)
    w1 = w1_ref[...]                                    # (2H, 4H) = [wih1; whh1]
    b1b = jnp.broadcast_to(b1_ref[...], (B, 4 * H))     # (B, 4H)

    # z is broadcast over time, so layer-0's input->gate contribution is loop invariant.
    xg0 = (jnp.dot(z_ref[...], wih0_ref[...], preferred_element_type=jnp.float32)
           + b0_ref[...])                               # (B, 4H)

    def sigmoid_full(x):
        # one EUP tanh instead of exp + divide; applied on the full-width vreg
        return 0.5 * (jnp.tanh(0.5 * x) + 1.0)

    zeros = jnp.zeros((B, H), jnp.float32)
    h0, c0, h1, c1 = zeros, zeros, zeros, zeros

    h1_steps = []
    for _ in range(T):  # T is small & static -> full unroll for the LLO scheduler
        # ---- LSTM layer 0 (PyTorch gate order i, f, g, o) ----
        g0 = xg0 + jnp.dot(h0, whh0, preferred_element_type=jnp.float32)
        s0 = sigmoid_full(g0)                           # full-width (B, 4H)
        t0 = jnp.tanh(g0)                               # full-width (B, 4H)
        c0 = s0[:, H:2 * H] * c0 + s0[:, 0:H] * t0[:, 2 * H:3 * H]
        h0 = s0[:, 3 * H:4 * H] * jnp.tanh(c0)

        # TODO(synk): nn.LSTM inter-layer dropout (p=0.2, training mode) omitted;
        # this implements inference semantics.

        # ---- LSTM layer 1: fused [x | h] @ [wih1; whh1] (single K=2H matmul) ----
        x1 = jnp.concatenate([h0, h1], axis=1)          # (B, 2H)
        g1 = jnp.dot(x1, w1, preferred_element_type=jnp.float32) + b1b
        s1 = sigmoid_full(g1)
        t1 = jnp.tanh(g1)
        c1 = s1[:, H:2 * H] * c1 + s1[:, 0:H] * t1[:, 2 * H:3 * H]
        h1 = s1[:, 3 * H:4 * H] * jnp.tanh(c1)

        h1_steps.append(h1)

    # ---- deferred output projection: one (T*B, H) @ (H, V) matmul ----
    # wp / bp are pre-scaled by 1/temperature in the wrapper.
    h_all = jnp.concatenate(h1_steps, axis=0)           # (T*B, H)
    logits = (jnp.dot(h_all, wp_ref[...], preferred_element_type=jnp.float32)
              + bp_ref[...])                            # (T*B, V)
    logits_ref[...] = logits.reshape(T, B, V)


def generator_logits_pallas(z, params, max_length, temperature):
    """Runs the 2-layer LSTM + output projection Pallas kernel.

    z: (B, latent) f32 (label embedding already added).
    Returns logits of shape (B, max_length, vocab) (batch_first, like PyTorch).
    """
    B, _ = z.shape
    H = params["whh0"].shape[0]
    V = params["wp"].shape[1]
    T = max_length

    inv_temp = jnp.float32(1.0 / temperature)
    # Fuse layer-1's input and recurrent weights into a single (2H, 4H) matrix, and fold
    # the temperature scale into the output projection so the kernel never multiplies by it.
    w1 = jnp.concatenate([params["wih1"], params["whh1"]], axis=0)   # (2H, 4H)
    wp = params["wp"] * inv_temp
    bp = params["bp"] * inv_temp

    vmem_spec = pl.BlockSpec(memory_space=pltpu.MemorySpace.VMEM)

    logits_tbv = pl.pallas_call(
        generator_lstm_kernel,
        out_shape=jax.ShapeDtypeStruct((T, B, V), jnp.float32),
        in_specs=[vmem_spec] * 8,
        out_specs=vmem_spec,
    )(z,
      params["wih0"], params["whh0"], params["b0"],
      w1, params["b1"],
      wp, bp)

    return jnp.transpose(logits_tbv, (1, 0, 2))  # -> (B, T, V)


def generator_forward(z, params, max_length, labels=None, temperature=1.0,
                      sample_key=None):
    """Mirrors Generator.forward: returns (tokens (B, T) int32, logits (B, T, V))."""
    if sample_key is None:
        sample_key = jax.random.PRNGKey(42)
    if labels is not None:
        z = z + params["label_embedding"][labels]          # nn.Embedding lookup (glue)
    logits = generator_logits_pallas(z, params, max_length, temperature)
    B, T, V = logits.shape
    # torch.multinomial(softmax(logits), 1) == categorical sampling from logits.
    tokens = jax.random.categorical(sample_key, logits.reshape(-1, V), axis=-1)
    tokens = tokens.reshape(B, T).astype(jnp.int32)
    return tokens, logits


def init_generator_params(key, latent_dim, hidden_dim, vocab_size):
    """Deterministic synthetic parameters (shapes match nn.LSTM(2 layers) + Linear + Embedding)."""
    ks = jax.random.split(key, 12)
    kH = 1.0 / jnp.sqrt(hidden_dim)
    kL = 1.0 / jnp.sqrt(hidden_dim)

    def u(k, shape, scale):
        return jax.random.uniform(k, shape, jnp.float32, -scale, scale)

    params = {
        # layer 0 (input_size = latent_dim); stored transposed: (in, 4H)
        "wih0": u(ks[0], (latent_dim, 4 * hidden_dim), kH),
        "whh0": u(ks[1], (hidden_dim, 4 * hidden_dim), kH),
        "b0":  (u(ks[2], (1, 4 * hidden_dim), kH) + u(ks[3], (1, 4 * hidden_dim), kH)),
        # layer 1 (input_size = hidden_dim)
        "wih1": u(ks[4], (hidden_dim, 4 * hidden_dim), kH),
        "whh1": u(ks[5], (hidden_dim, 4 * hidden_dim), kH),
        "b1":  (u(ks[6], (1, 4 * hidden_dim), kH) + u(ks[7], (1, 4 * hidden_dim), kH)),
        # output projection: (H, V) transposed Linear weight, bias (1, V)
        "wp":  u(ks[8], (hidden_dim, vocab_size), kL),
        "bp":  u(ks[9], (1, vocab_size), kL),
        # label embedding: (2, latent_dim), N(0,1) like nn.Embedding default
        "label_embedding": jax.random.normal(ks[10], (2, latent_dim), jnp.float32),
    }
    return params


def _reference_logits(z, params, max_length, labels, temperature):
    """Pure-JAX reference of LSTM + projection for a correctness check."""
    if labels is not None:
        z = z + params["label_embedding"][labels]
    B, _ = z.shape
    H = params["whh0"].shape[0]

    def sig(x):
        return 1.0 / (1.0 + jnp.exp(-x))

    h0 = jnp.zeros((B, H)); c0 = jnp.zeros((B, H))
    h1 = jnp.zeros((B, H)); c1 = jnp.zeros((B, H))
    outs = []
    hp = functools.partial(jnp.matmul, precision="highest")
    for _ in range(max_length):
        g0 = hp(z, params["wih0"]) + hp(h0, params["whh0"]) + params["b0"]
        i0, f0, gg0, o0 = (sig(g0[:, 0:H]), sig(g0[:, H:2*H]),
                           jnp.tanh(g0[:, 2*H:3*H]), sig(g0[:, 3*H:4*H]))
        c0 = f0 * c0 + i0 * gg0
        h0 = o0 * jnp.tanh(c0)
        g1 = hp(h0, params["wih1"]) + hp(h1, params["whh1"]) + params["b1"]
        i1, f1, gg1, o1 = (sig(g1[:, 0:H]), sig(g1[:, H:2*H]),
                           jnp.tanh(g1[:, 2*H:3*H]), sig(g1[:, 3*H:4*H]))
        c1 = f1 * c1 + i1 * gg1
        h1 = o1 * jnp.tanh(c1)
        outs.append((hp(h1, params["wp"]) + params["bp"]) / temperature)
    return jnp.stack(outs, axis=1)  # (B, T, V)


if __name__ == "__main__":
    # Small shapes consistent with the module: latent=16, hidden=32, vocab=128, T=8.
    B, LATENT, HIDDEN, VOCAB, MAX_LEN = 8, 16, 32, 128, 8
    TEMPERATURE = 1.0

    key = jax.random.PRNGKey(0)
    kp, kz, kl, ksamp = jax.random.split(key, 4)

    params = init_generator_params(kp, LATENT, HIDDEN, VOCAB)
    z = jax.random.normal(kz, (B, LATENT), jnp.float32)
    labels = jax.random.randint(kl, (B,), 0, 2, jnp.int32)

    tokens, logits = generator_forward(z, params, MAX_LEN, labels=labels,
                                       temperature=TEMPERATURE, sample_key=ksamp)
    jax.block_until_ready((tokens, logits))

    assert tokens.shape == (B, MAX_LEN)
    assert logits.shape == (B, MAX_LEN, VOCAB)

    ref = _reference_logits(z, params, MAX_LEN, labels, TEMPERATURE)
    assert jnp.allclose(logits, ref, atol=1e-2, rtol=1e-2), "logits mismatch vs reference"

    print("KERNEL_OK")
</pallas_src>

<mosaic_0001>
module attributes {stable_mosaic.version = 11 : i64} {
  func.func @generator_lstm_kernel(%arg0: memref<8x16xf32, #tpu.memory_space<vmem>>, %arg1: memref<16x128xf32, #tpu.memory_space<vmem>>, %arg2: memref<32x128xf32, #tpu.memory_space<vmem>>, %arg3: memref<1x128xf32, #tpu.memory_space<vmem>>, %arg4: memref<64x128xf32, #tpu.memory_space<vmem>>, %arg5: memref<1x128xf32, #tpu.memory_space<vmem>>, %arg6: memref<32x128xf32, #tpu.memory_space<vmem>>, %arg7: memref<1x128xf32, #tpu.memory_space<vmem>>, %arg8: memref<8x8x128xf32, #tpu.memory_space<vmem>>) attributes {dimension_semantics = [], scalar_prefetch = 0 : i64, scratch_operands = 0 : i64, tpu.core_type = #tpu.core_type<tc>} {
    %c0 = arith.constant 0 : index
    %c0_0 = arith.constant 0 : index
    %0 = vector.load %arg2[%c0, %c0_0] : memref<32x128xf32, #tpu.memory_space<vmem>>, vector<32x128xf32>
    %c0_1 = arith.constant 0 : index
    %c0_2 = arith.constant 0 : index
    %1 = vector.load %arg4[%c0_1, %c0_2] : memref<64x128xf32, #tpu.memory_space<vmem>>, vector<64x128xf32>
    %c0_3 = arith.constant 0 : index
    %c0_4 = arith.constant 0 : index
    %2 = vector.load %arg5[%c0_3, %c0_4] : memref<1x128xf32, #tpu.memory_space<vmem>>, vector<1x128xf32>
    %3 = vector.shape_cast %2 : vector<1x128xf32> to vector<1x128xf32>
    %4 = vector.broadcast %3 : vector<1x128xf32> to vector<8x128xf32>
    %c0_5 = arith.constant 0 : index
    %c0_6 = arith.constant 0 : index
    %5 = vector.load %arg0[%c0_5, %c0_6] : memref<8x16xf32, #tpu.memory_space<vmem>>, vector<8x16xf32>
    %c0_7 = arith.constant 0 : index
    %c0_8 = arith.constant 0 : index
    %6 = vector.load %arg1[%c0_7, %c0_8] : memref<16x128xf32, #tpu.memory_space<vmem>>, vector<16x128xf32>
    %cst = arith.constant dense<0.000000e+00> : vector<8x128xf32>
    %7 = tpu.matmul %5, %6, %cst {dimension_numbers = #tpu.dot_dimension_numbers<[1], [0], [0], [1], [0, 0, 1, 1], [], []>} : vector<8x16xf32>, vector<16x128xf32>, vector<8x128xf32> -> vector<8x128xf32>
    %c0_9 = arith.constant 0 : index
    %c0_10 = arith.constant 0 : index
    %8 = vector.load %arg3[%c0_9, %c0_10] : memref<1x128xf32, #tpu.memory_space<vmem>>, vector<1x128xf32>
    %9 = vector.broadcast %8 : vector<1x128xf32> to vector<8x128xf32>
    %10 = arith.addf %7, %9 : vector<8x128xf32>
    %cst_11 = arith.constant 0.000000e+00 : f32
    %11 = vector.broadcast %cst_11 : f32 to vector<8x32xf32>
    %cst_12 = arith.constant dense<0.000000e+00> : vector<8x128xf32>
    %12 = tpu.matmul %11, %0, %cst_12 {dimension_numbers = #tpu.dot_dimension_numbers<[1], [0], [0], [1], [0, 0, 1, 1], [], []>} : vector<8x32xf32>, vector<32x128xf32>, vector<8x128xf32> -> vector<8x128xf32>
    %13 = arith.addf %10, %12 : vector<8x128xf32>
    %cst_13 = arith.constant 5.000000e-01 : f32
    %14 = vector.broadcast %cst_13 : f32 to vector<8x128xf32>
    %15 = arith.mulf %14, %13 : vector<8x128xf32>
    %16 = math.tanh %15 : vector<8x128xf32>
    %cst_14 = arith.constant 1.000000e+00 : f32
    %17 = vector.broadcast %cst_14 : f32 to vector<8x128xf32>
    %18 = arith.addf %16, %17 : vector<8x128xf32>
    %cst_15 = arith.constant 5.000000e-01 : f32
    %19 = vector.broadcast %cst_15 : f32 to vector<8x128xf32>
    %20 = arith.mulf %19, %18 : vector<8x128xf32>
    %21 = math.tanh %13 : vector<8x128xf32>
    %22 = vector.extract_strided_slice %20 {offsets = [0, 32], sizes = [8, 32], strides = [1, 1]} : vector<8x128xf32> to vector<8x32xf32>
    %23 = arith.mulf %22, %11 : vector<8x32xf32>
    %24 = vector.extract_strided_slice %20 {offsets = [0, 0], sizes = [8, 32], strides = [1, 1]} : vector<8x128xf32> to vector<8x32xf32>
    %25 = vector.extract_strided_slice %21 {offsets = [0, 64], sizes = [8, 32], strides = [1, 1]} : vector<8x128xf32> to vector<8x32xf32>
    %26 = arith.mulf %24, %25 : vector<8x32xf32>
    %27 = arith.addf %23, %26 : vector<8x32xf32>
    %28 = vector.extract_strided_slice %20 {offsets = [0, 96], sizes = [8, 32], strides = [1, 1]} : vector<8x128xf32> to vector<8x32xf32>
    %29 = math.tanh %27 : vector<8x32xf32>
    %30 = arith.mulf %28, %29 : vector<8x32xf32>
    %31 = tpu.concatenate %30, %11 in 1 : vector<8x32xf32>, vector<8x32xf32> -> vector<8x64xf32>
    %cst_16 = arith.constant dense<0.000000e+00> : vector<8x128xf32>
    %32 = tpu.matmul %31, %1, %cst_16 {dimension_numbers = #tpu.dot_dimension_numbers<[1], [0], [0], [1], [0, 0, 1, 1], [], []>} : vector<8x64xf32>, vector<64x128xf32>, vector<8x128xf32> -> vector<8x128xf32>
    %33 = arith.addf %32, %4 : vector<8x128xf32>
    %cst_17 = arith.constant 5.000000e-01 : f32
    %34 = vector.broadcast %cst_17 : f32 to vector<8x128xf32>
    %35 = arith.mulf %34, %33 : vector<8x128xf32>
    %36 = math.tanh %35 : vector<8x128xf32>
    %cst_18 = arith.constant 1.000000e+00 : f32
    %37 = vector.broadcast %cst_18 : f32 to vector<8x128xf32>
    %38 = arith.addf %36, %37 : vector<8x128xf32>
    %cst_19 = arith.constant 5.000000e-01 : f32
    %39 = vector.broadcast %cst_19 : f32 to vector<8x128xf32>
    %40 = arith.mulf %39, %38 : vector<8x128xf32>
    %41 = math.tanh %33 : vector<8x128xf32>
    %42 = vector.extract_strided_slice %40 {offsets = [0, 32], sizes = [8, 32], strides = [1, 1]} : vector<8x128xf32> to vector<8x32xf32>
    %43 = arith.mulf %42, %11 : vector<8x32xf32>
    %44 = vector.extract_strided_slice %40 {offsets = [0, 0], sizes = [8, 32], strides = [1, 1]} : vector<8x128xf32> to vector<8x32xf32>
    %45 = vector.extract_strided_slice %41 {offsets = [0, 64], sizes = [8, 32], strides = [1, 1]} : vector<8x128xf32> to vector<8x32xf32>
    %46 = arith.mulf %44, %45 : vector<8x32xf32>
    %47 = arith.addf %43, %46 : vector<8x32xf32>
    %48 = vector.extract_strided_slice %40 {offsets = [0, 96], sizes = [8, 32], strides = [1, 1]} : vector<8x128xf32> to vector<8x32xf32>
    %49 = math.tanh %47 : vector<8x32xf32>
    %50 = arith.mulf %48, %49 : vector<8x32xf32>
    %cst_20 = arith.constant dense<0.000000e+00> : vector<8x128xf32>
    %51 = tpu.matmul %30, %0, %cst_20 {dimension_numbers = #tpu.dot_dimension_numbers<[1], [0], [0], [1], [0, 0, 1, 1], [], []>} : vector<8x32xf32>, vector<32x128xf32>, vector<8x128xf32> -> vector<8x128xf32>
    %52 = arith.addf %10, %51 : vector<8x128xf32>
    %cst_21 = arith.constant 5.000000e-01 : f32
    %53 = vector.broadcast %cst_21 : f32 to vector<8x128xf32>
    %54 = arith.mulf %53, %52 : vector<8x128xf32>
    %55 = math.tanh %54 : vector<8x128xf32>
    %cst_22 = arith.constant 1.000000e+00 : f32
    %56 = vector.broadcast %cst_22 : f32 to vector<8x128xf32>
    %57 = arith.addf %55, %56 : vector<8x128xf32>
    %cst_23 = arith.constant 5.000000e-01 : f32
    %58 = vector.broadcast %cst_23 : f32 to vector<8x128xf32>
    %59 = arith.mulf %58, %57 : vector<8x128xf32>
    %60 = math.tanh %52 : vector<8x128xf32>
    %61 = vector.extract_strided_slice %59 {offsets = [0, 32], sizes = [8, 32], strides = [1, 1]} : vector<8x128xf32> to vector<8x32xf32>
    %62 = arith.mulf %61, %27 : vector<8x32xf32>
    %63 = vector.extract_strided_slice %59 {offsets = [0, 0], sizes = [8, 32], strides = [1, 1]} : vector<8x128xf32> to vector<8x32xf32>
    %64 = vector.extract_strided_slice %60 {offsets = [0, 64], sizes = [8, 32], strides = [1, 1]} : vector<8x128xf32> to vector<8x32xf32>
    %65 = arith.mulf %63, %64 : vector<8x32xf32>
    %66 = arith.addf %62, %65 : vector<8x32xf32>
    %67 = vector.extract_strided_slice %59 {offsets = [0, 96], sizes = [8, 32], strides = [1, 1]} : vector<8x128xf32> to vector<8x32xf32>
    %68 = math.tanh %66 : vector<8x32xf32>
    %69 = arith.mulf %67, %68 : vector<8x32xf32>
    %70 = tpu.concatenate %69, %50 in 1 : vector<8x32xf32>, vector<8x32xf32> -> vector<8x64xf32>
    %cst_24 = arith.constant dense<0.000000e+00> : vector<8x128xf32>
    %71 = tpu.matmul %70, %1, %cst_24 {dimension_numbers = #tpu.dot_dimension_numbers<[1], [0], [0], [1], [0, 0, 1, 1], [], []>} : vector<8x64xf32>, vector<64x128xf32>, vector<8x128xf32> -> vector<8x128xf32>
    %72 = arith.addf %71, %4 : vector<8x128xf32>
    %cst_25 = arith.constant 5.000000e-01 : f32
    %73 = vector.broadcast %cst_25 : f32 to vector<8x128xf32>
    %74 = arith.mulf %73, %72 : vector<8x128xf32>
    %75 = math.tanh %74 : vector<8x128xf32>
    %cst_26 = arith.constant 1.000000e+00 : f32
    %76 = vector.broadcast %cst_26 : f32 to vector<8x128xf32>
    %77 = arith.addf %75, %76 : vector<8x128xf32>
    %cst_27 = arith.constant 5.000000e-01 : f32
    %78 = vector.broadcast %cst_27 : f32 to vector<8x128xf32>
    %79 = arith.mulf %78, %77 : vector<8x128xf32>
    %80 = math.tanh %72 : vector<8x128xf32>
    %81 = vector.extract_strided_slice %79 {offsets = [0, 32], sizes = [8, 32], strides = [1, 1]} : vector<8x128xf32> to vector<8x32xf32>
    %82 = arith.mulf %81, %47 : vector<8x32xf32>
    %83 = vector.extract_strided_slice %79 {offsets = [0, 0], sizes = [8, 32], strides = [1, 1]} : vector<8x128xf32> to vector<8x32xf32>
    %84 = vector.extract_strided_slice %80 {offsets = [0, 64], sizes = [8, 32], strides = [1, 1]} : vector<8x128xf32> to vector<8x32xf32>
    %85 = arith.mulf %83, %84 : vector<8x32xf32>
    %86 = arith.addf %82, %85 : vector<8x32xf32>
    %87 = vector.extract_strided_slice %79 {offsets = [0, 96], sizes = [8, 32], strides = [1, 1]} : vector<8x128xf32> to vector<8x32xf32>
    %88 = math.tanh %86 : vector<8x32xf32>
    %89 = arith.mulf %87, %88 : vector<8x32xf32>
    %cst_28 = arith.constant dense<0.000000e+00> : vector<8x128xf32>
    %90 = tpu.matmul %69, %0, %cst_28 {dimension_numbers = #tpu.dot_dimension_numbers<[1], [0], [0], [1], [0, 0, 1, 1], [], []>} : vector<8x32xf32>, vector<32x128xf32>, vector<8x128xf32> -> vector<8x128xf32>
    %91 = arith.addf %10, %90 : vector<8x128xf32>
    %cst_29 = arith.constant 5.000000e-01 : f32
    %92 = vector.broadcast %cst_29 : f32 to vector<8x128xf32>
    %93 = arith.mulf %92, %91 : vector<8x128xf32>
    %94 = math.tanh %93 : vector<8x128xf32>
    %cst_30 = arith.constant 1.000000e+00 : f32
    %95 = vector.broadcast %cst_30 : f32 to vector<8x128xf32>
    %96 = arith.addf %94, %95 : vector<8x128xf32>
    %cst_31 = arith.constant 5.000000e-01 : f32
    %97 = vector.broadcast %cst_31 : f32 to vector<8x128xf32>
    %98 = arith.mulf %97, %96 : vector<8x128xf32>
    %99 = math.tanh %91 : vector<8x128xf32>
    %100 = vector.extract_strided_slice %98 {offsets = [0, 32], sizes = [8, 32], strides = [1, 1]} : vector<8x128xf32> to vector<8x32xf32>
    %101 = arith.mulf %100, %66 : vector<8x32xf32>
    %102 = vector.extract_strided_slice %98 {offsets = [0, 0], sizes = [8, 32], strides = [1, 1]} : vector<8x128xf32> to vector<8x32xf32>
    %103 = vector.extract_strided_slice %99 {offsets = [0, 64], sizes = [8, 32], strides = [1, 1]} : vector<8x128xf32> to vector<8x32xf32>
    %104 = arith.mulf %102, %103 : vector<8x32xf32>
    %105 = arith.addf %101, %104 : vector<8x32xf32>
    %106 = vector.extract_strided_slice %98 {offsets = [0, 96], sizes = [8, 32], strides = [1, 1]} : vector<8x128xf32> to vector<8x32xf32>
    %107 = math.tanh %105 : vector<8x32xf32>
    %108 = arith.mulf %106, %107 : vector<8x32xf32>
    %109 = tpu.concatenate %108, %89 in 1 : vector<8x32xf32>, vector<8x32xf32> -> vector<8x64xf32>
    %cst_32 = arith.constant dense<0.000000e+00> : vector<8x128xf32>
    %110 = tpu.matmul %109, %1, %cst_32 {dimension_numbers = #tpu.dot_dimension_numbers<[1], [0], [0], [1], [0, 0, 1, 1], [], []>} : vector<8x64xf32>, vector<64x128xf32>, vector<8x128xf32> -> vector<8x128xf32>
    %111 = arith.addf %110, %4 : vector<8x128xf32>
    %cst_33 = arith.constant 5.000000e-01 : f32
    %112 = vector.broadcast %cst_33 : f32 to vector<8x128xf32>
    %113 = arith.mulf %112, %111 : vector<8x128xf32>
    %114 = math.tanh %113 : vector<8x128xf32>
    %cst_34 = arith.constant 1.000000e+00 : f32
    %115 = vector.broadcast %cst_34 : f32 to vector<8x128xf32>
    %116 = arith.addf %114, %115 : vector<8x128xf32>
    %cst_35 = arith.constant 5.000000e-01 : f32
    %117 = vector.broadcast %cst_35 : f32 to vector<8x128xf32>
    %118 = arith.mulf %117, %116 : vector<8x128xf32>
    %119 = math.tanh %111 : vector<8x128xf32>
    %120 = vector.extract_strided_slice %118 {offsets = [0, 32], sizes = [8, 32], strides = [1, 1]} : vector<8x128xf32> to vector<8x32xf32>
    %121 = arith.mulf %120, %86 : vector<8x32xf32>
    %122 = vector.extract_strided_slice %118 {offsets = [0, 0], sizes = [8, 32], strides = [1, 1]} : vector<8x128xf32> to vector<8x32xf32>
    %123 = vector.extract_strided_slice %119 {offsets = [0, 64], sizes = [8, 32], strides = [1, 1]} : vector<8x128xf32> to vector<8x32xf32>
    %124 = arith.mulf %122, %123 : vector<8x32xf32>
    %125 = arith.addf %121, %124 : vector<8x32xf32>
    %126 = vector.extract_strided_slice %118 {offsets = [0, 96], sizes = [8, 32], strides = [1, 1]} : vector<8x128xf32> to vector<8x32xf32>
    %127 = math.tanh %125 : vector<8x32xf32>
    %128 = arith.mulf %126, %127 : vector<8x32xf32>
    %cst_36 = arith.constant dense<0.000000e+00> : vector<8x128xf32>
    %129 = tpu.matmul %108, %0, %cst_36 {dimension_numbers = #tpu.dot_dimension_numbers<[1], [0], [0], [1], [0, 0, 1, 1], [], []>} : vector<8x32xf32>, vector<32x128xf32>, vector<8x128xf32> -> vector<8x128xf32>
    %130 = arith.addf %10, %129 : vector<8x128xf32>
    %cst_37 = arith.constant 5.000000e-01 : f32
    %131 = vector.broadcast %cst_37 : f32 to vector<8x128xf32>
    %132 = arith.mulf %131, %130 : vector<8x128xf32>
    %133 = math.tanh %132 : vector<8x128xf32>
    %cst_38 = arith.constant 1.000000e+00 : f32
    %134 = vector.broadcast %cst_38 : f32 to vector<8x128xf32>
    %135 = arith.addf %133, %134 : vector<8x128xf32>
    %cst_39 = arith.constant 5.000000e-01 : f32
    %136 = vector.broadcast %cst_39 : f32 to vector<8x128xf32>
    %137 = arith.mulf %136, %135 : vector<8x128xf32>
    %138 = math.tanh %130 : vector<8x128xf32>
    %139 = vector.extract_strided_slice %137 {offsets = [0, 32], sizes = [8, 32], strides = [1, 1]} : vector<8x128xf32> to vector<8x32xf32>
    %140 = arith.mulf %139, %105 : vector<8x32xf32>
    %141 = vector.extract_strided_slice %137 {offsets = [0, 0], sizes = [8, 32], strides = [1, 1]} : vector<8x128xf32> to vector<8x32xf32>
    %142 = vector.extract_strided_slice %138 {offsets = [0, 64], sizes = [8, 32], strides = [1, 1]} : vector<8x128xf32> to vector<8x32xf32>
    %143 = arith.mulf %141, %142 : vector<8x32xf32>
    %144 = arith.addf %140, %143 : vector<8x32xf32>
    %145 = vector.extract_strided_slice %137 {offsets = [0, 96], sizes = [8, 32], strides = [1, 1]} : vector<8x128xf32> to vector<8x32xf32>
    %146 = math.tanh %144 : vector<8x32xf32>
    %147 = arith.mulf %145, %146 : vector<8x32xf32>
    %148 = tpu.concatenate %147, %128 in 1 : vector<8x32xf32>, vector<8x32xf32> -> vector<8x64xf32>
    %cst_40 = arith.constant dense<0.000000e+00> : vector<8x128xf32>
    %149 = tpu.matmul %148, %1, %cst_40 {dimension_numbers = #tpu.dot_dimension_numbers<[1], [0], [0], [1], [0, 0, 1, 1], [], []>} : vector<8x64xf32>, vector<64x128xf32>, vector<8x128xf32> -> vector<8x128xf32>
    %150 = arith.addf %149, %4 : vector<8x128xf32>
    %cst_41 = arith.constant 5.000000e-01 : f32
    %151 = vector.broadcast %cst_41 : f32 to vector<8x128xf32>
    %152 = arith.mulf %151, %150 : vector<8x128xf32>
    %153 = math.tanh %152 : vector<8x128xf32>
    %cst_42 = arith.constant 1.000000e+00 : f32
    %154 = vector.broadcast %cst_42 : f32 to vector<8x128xf32>
    %155 = arith.addf %153, %154 : vector<8x128xf32>
    %cst_43 = arith.constant 5.000000e-01 : f32
    %156 = vector.broadcast %cst_43 : f32 to vector<8x128xf32>
    %157 = arith.mulf %156, %155 : vector<8x128xf32>
    %158 = math.tanh %150 : vector<8x128xf32>
    %159 = vector.extract_strided_slice %157 {offsets = [0, 32], sizes = [8, 32], strides = [1, 1]} : vector<8x128xf32> to vector<8x32xf32>
    %160 = arith.mulf %159, %125 : vector<8x32xf32>
    %161 = vector.extract_strided_slice %157 {offsets = [0, 0], sizes = [8, 32], strides = [1, 1]} : vector<8x128xf32> to vector<8x32xf32>
    %162 = vector.extract_strided_slice %158 {offsets = [0, 64], sizes = [8, 32], strides = [1, 1]} : vector<8x128xf32> to vector<8x32xf32>
    %163 = arith.mulf %161, %162 : vector<8x32xf32>
    %164 = arith.addf %160, %163 : vector<8x32xf32>
    %165 = vector.extract_strided_slice %157 {offsets = [0, 96], sizes = [8, 32], strides = [1, 1]} : vector<8x128xf32> to vector<8x32xf32>
    %166 = math.tanh %164 : vector<8x32xf32>
    %167 = arith.mulf %165, %166 : vector<8x32xf32>
    %cst_44 = arith.constant dense<0.000000e+00> : vector<8x128xf32>
    %168 = tpu.matmul %147, %0, %cst_44 {dimension_numbers = #tpu.dot_dimension_numbers<[1], [0], [0], [1], [0, 0, 1, 1], [], []>} : vector<8x32xf32>, vector<32x128xf32>, vector<8x128xf32> -> vector<8x128xf32>
    %169 = arith.addf %10, %168 : vector<8x128xf32>
    %cst_45 = arith.constant 5.000000e-01 : f32
    %170 = vector.broadcast %cst_45 : f32 to vector<8x128xf32>
    %171 = arith.mulf %170, %169 : vector<8x128xf32>
    %172 = math.tanh %171 : vector<8x128xf32>
    %cst_46 = arith.constant 1.000000e+00 : f32
    %173 = vector.broadcast %cst_46 : f32 to vector<8x128xf32>
    %174 = arith.addf %172, %173 : vector<8x128xf32>
    %cst_47 = arith.constant 5.000000e-01 : f32
    %175 = vector.broadcast %cst_47 : f32 to vector<8x128xf32>
    %176 = arith.mulf %175, %174 : vector<8x128xf32>
    %177 = math.tanh %169 : vector<8x128xf32>
    %178 = vector.extract_strided_slice %176 {offsets = [0, 32], sizes = [8, 32], strides = [1, 1]} : vector<8x128xf32> to vector<8x32xf32>
    %179 = arith.mulf %178, %144 : vector<8x32xf32>
    %180 = vector.extract_strided_slice %176 {offsets = [0, 0], sizes = [8, 32], strides = [1, 1]} : vector<8x128xf32> to vector<8x32xf32>
    %181 = vector.extract_strided_slice %177 {offsets = [0, 64], sizes = [8, 32], strides = [1, 1]} : vector<8x128xf32> to vector<8x32xf32>
    %182 = arith.mulf %180, %181 : vector<8x32xf32>
    %183 = arith.addf %179, %182 : vector<8x32xf32>
    %184 = vector.extract_strided_slice %176 {offsets = [0, 96], sizes = [8, 32], strides = [1, 1]} : vector<8x128xf32> to vector<8x32xf32>
    %185 = math.tanh %183 : vector<8x32xf32>
    %186 = arith.mulf %184, %185 : vector<8x32xf32>
    %187 = tpu.concatenate %186, %167 in 1 : vector<8x32xf32>, vector<8x32xf32> -> vector<8x64xf32>
    %cst_48 = arith.constant dense<0.000000e+00> : vector<8x128xf32>
    %188 = tpu.matmul %187, %1, %cst_48 {dimension_numbers = #tpu.dot_dimension_numbers<[1], [0], [0], [1], [0, 0, 1, 1], [], []>} : vector<8x64xf32>, vector<64x128xf32>, vector<8x128xf32> -> vector<8x128xf32>
    %189 = arith.addf %188, %4 : vector<8x128xf32>
    %cst_49 = arith.constant 5.000000e-01 : f32
    %190 = vector.broadcast %cst_49 : f32 to vector<8x128xf32>
    %191 = arith.mulf %190, %189 : vector<8x128xf32>
    %192 = math.tanh %191 : vector<8x128xf32>
    %cst_50 = arith.constant 1.000000e+00 : f32
    %193 = vector.broadcast %cst_50 : f32 to vector<8x128xf32>
    %194 = arith.addf %192, %193 : vector<8x128xf32>
    %cst_51 = arith.constant 5.000000e-01 : f32
    %195 = vector.broadcast %cst_51 : f32 to vector<8x128xf32>
    %196 = arith.mulf %195, %194 : vector<8x128xf32>
    %197 = math.tanh %189 : vector<8x128xf32>
    %198 = vector.extract_strided_slice %196 {offsets = [0, 32], sizes = [8, 32], strides = [1, 1]} : vector<8x128xf32> to vector<8x32xf32>
    %199 = arith.mulf %198, %164 : vector<8x32xf32>
    %200 = vector.extract_strided_slice %196 {offsets = [0, 0], sizes = [8, 32], strides = [1, 1]} : vector<8x128xf32> to vector<8x32xf32>
    %201 = vector.extract_strided_slice %197 {offsets = [0, 64], sizes = [8, 32], strides = [1, 1]} : vector<8x128xf32> to vector<8x32xf32>
    %202 = arith.mulf %200, %201 : vector<8x32xf32>
    %203 = arith.addf %199, %202 : vector<8x32xf32>
    %204 = vector.extract_strided_slice %196 {offsets = [0, 96], sizes = [8, 32], strides = [1, 1]} : vector<8x128xf32> to vector<8x32xf32>
    %205 = math.tanh %203 : vector<8x32xf32>
    %206 = arith.mulf %204, %205 : vector<8x32xf32>
    %cst_52 = arith.constant dense<0.000000e+00> : vector<8x128xf32>
    %207 = tpu.matmul %186, %0, %cst_52 {dimension_numbers = #tpu.dot_dimension_numbers<[1], [0], [0], [1], [0, 0, 1, 1], [], []>} : vector<8x32xf32>, vector<32x128xf32>, vector<8x128xf32> -> vector<8x128xf32>
    %208 = arith.addf %10, %207 : vector<8x128xf32>
    %cst_53 = arith.constant 5.000000e-01 : f32
    %209 = vector.broadcast %cst_53 : f32 to vector<8x128xf32>
    %210 = arith.mulf %209, %208 : vector<8x128xf32>
    %211 = math.tanh %210 : vector<8x128xf32>
    %cst_54 = arith.constant 1.000000e+00 : f32
    %212 = vector.broadcast %cst_54 : f32 to vector<8x128xf32>
    %213 = arith.addf %211, %212 : vector<8x128xf32>
    %cst_55 = arith.constant 5.000000e-01 : f32
    %214 = vector.broadcast %cst_55 : f32 to vector<8x128xf32>
    %215 = arith.mulf %214, %213 : vector<8x128xf32>
    %216 = math.tanh %208 : vector<8x128xf32>
    %217 = vector.extract_strided_slice %215 {offsets = [0, 32], sizes = [8, 32], strides = [1, 1]} : vector<8x128xf32> to vector<8x32xf32>
    %218 = arith.mulf %217, %183 : vector<8x32xf32>
    %219 = vector.extract_strided_slice %215 {offsets = [0, 0], sizes = [8, 32], strides = [1, 1]} : vector<8x128xf32> to vector<8x32xf32>
    %220 = vector.extract_strided_slice %216 {offsets = [0, 64], sizes = [8, 32], strides = [1, 1]} : vector<8x128xf32> to vector<8x32xf32>
    %221 = arith.mulf %219, %220 : vector<8x32xf32>
    %222 = arith.addf %218, %221 : vector<8x32xf32>
    %223 = vector.extract_strided_slice %215 {offsets = [0, 96], sizes = [8, 32], strides = [1, 1]} : vector<8x128xf32> to vector<8x32xf32>
    %224 = math.tanh %222 : vector<8x32xf32>
    %225 = arith.mulf %223, %224 : vector<8x32xf32>
    %226 = tpu.concatenate %225, %206 in 1 : vector<8x32xf32>, vector<8x32xf32> -> vector<8x64xf32>
    %cst_56 = arith.constant dense<0.000000e+00> : vector<8x128xf32>
    %227 = tpu.matmul %226, %1, %cst_56 {dimension_numbers = #tpu.dot_dimension_numbers<[1], [0], [0], [1], [0, 0, 1, 1], [], []>} : vector<8x64xf32>, vector<64x128xf32>, vector<8x128xf32> -> vector<8x128xf32>
    %228 = arith.addf %227, %4 : vector<8x128xf32>
    %cst_57 = arith.constant 5.000000e-01 : f32
    %229 = vector.broadcast %cst_57 : f32 to vector<8x128xf32>
    %230 = arith.mulf %229, %228 : vector<8x128xf32>
    %231 = math.tanh %230 : vector<8x128xf32>
    %cst_58 = arith.constant 1.000000e+00 : f32
    %232 = vector.broadcast %cst_58 : f32 to vector<8x128xf32>
    %233 = arith.addf %231, %232 : vector<8x128xf32>
    %cst_59 = arith.constant 5.000000e-01 : f32
    %234 = vector.broadcast %cst_59 : f32 to vector<8x128xf32>
    %235 = arith.mulf %234, %233 : vector<8x128xf32>
    %236 = math.tanh %228 : vector<8x128xf32>
    %237 = vector.extract_strided_slice %235 {offsets = [0, 32], sizes = [8, 32], strides = [1, 1]} : vector<8x128xf32> to vector<8x32xf32>
    %238 = arith.mulf %237, %203 : vector<8x32xf32>
    %239 = vector.extract_strided_slice %235 {offsets = [0, 0], sizes = [8, 32], strides = [1, 1]} : vector<8x128xf32> to vector<8x32xf32>
    %240 = vector.extract_strided_slice %236 {offsets = [0, 64], sizes = [8, 32], strides = [1, 1]} : vector<8x128xf32> to vector<8x32xf32>
    %241 = arith.mulf %239, %240 : vector<8x32xf32>
    %242 = arith.addf %238, %241 : vector<8x32xf32>
    %243 = vector.extract_strided_slice %235 {offsets = [0, 96], sizes = [8, 32], strides = [1, 1]} : vector<8x128xf32> to vector<8x32xf32>
    %244 = math.tanh %242 : vector<8x32xf32>
    %245 = arith.mulf %243, %244 : vector<8x32xf32>
    %cst_60 = arith.constant dense<0.000000e+00> : vector<8x128xf32>
    %246 = tpu.matmul %225, %0, %cst_60 {dimension_numbers = #tpu.dot_dimension_numbers<[1], [0], [0], [1], [0, 0, 1, 1], [], []>} : vector<8x32xf32>, vector<32x128xf32>, vector<8x128xf32> -> vector<8x128xf32>
    %247 = arith.addf %10, %246 : vector<8x128xf32>
    %cst_61 = arith.constant 5.000000e-01 : f32
    %248 = vector.broadcast %cst_61 : f32 to vector<8x128xf32>
    %249 = arith.mulf %248, %247 : vector<8x128xf32>
    %250 = math.tanh %249 : vector<8x128xf32>
    %cst_62 = arith.constant 1.000000e+00 : f32
    %251 = vector.broadcast %cst_62 : f32 to vector<8x128xf32>
    %252 = arith.addf %250, %251 : vector<8x128xf32>
    %cst_63 = arith.constant 5.000000e-01 : f32
    %253 = vector.broadcast %cst_63 : f32 to vector<8x128xf32>
    %254 = arith.mulf %253, %252 : vector<8x128xf32>
    %255 = math.tanh %247 : vector<8x128xf32>
    %256 = vector.extract_strided_slice %254 {offsets = [0, 32], sizes = [8, 32], strides = [1, 1]} : vector<8x128xf32> to vector<8x32xf32>
    %257 = arith.mulf %256, %222 : vector<8x32xf32>
    %258 = vector.extract_strided_slice %254 {offsets = [0, 0], sizes = [8, 32], strides = [1, 1]} : vector<8x128xf32> to vector<8x32xf32>
    %259 = vector.extract_strided_slice %255 {offsets = [0, 64], sizes = [8, 32], strides = [1, 1]} : vector<8x128xf32> to vector<8x32xf32>
    %260 = arith.mulf %258, %259 : vector<8x32xf32>
    %261 = arith.addf %257, %260 : vector<8x32xf32>
    %262 = vector.extract_strided_slice %254 {offsets = [0, 96], sizes = [8, 32], strides = [1, 1]} : vector<8x128xf32> to vector<8x32xf32>
    %263 = math.tanh %261 : vector<8x32xf32>
    %264 = arith.mulf %262, %263 : vector<8x32xf32>
    %265 = tpu.concatenate %264, %245 in 1 : vector<8x32xf32>, vector<8x32xf32> -> vector<8x64xf32>
    %cst_64 = arith.constant dense<0.000000e+00> : vector<8x128xf32>
    %266 = tpu.matmul %265, %1, %cst_64 {dimension_numbers = #tpu.dot_dimension_numbers<[1], [0], [0], [1], [0, 0, 1, 1], [], []>} : vector<8x64xf32>, vector<64x128xf32>, vector<8x128xf32> -> vector<8x128xf32>
    %267 = arith.addf %266, %4 : vector<8x128xf32>
    %cst_65 = arith.constant 5.000000e-01 : f32
    %268 = vector.broadcast %cst_65 : f32 to vector<8x128xf32>
    %269 = arith.mulf %268, %267 : vector<8x128xf32>
    %270 = math.tanh %269 : vector<8x128xf32>
    %cst_66 = arith.constant 1.000000e+00 : f32
    %271 = vector.broadcast %cst_66 : f32 to vector<8x128xf32>
    %272 = arith.addf %270, %271 : vector<8x128xf32>
    %cst_67 = arith.constant 5.000000e-01 : f32
    %273 = vector.broadcast %cst_67 : f32 to vector<8x128xf32>
    %274 = arith.mulf %273, %272 : vector<8x128xf32>
    %275 = math.tanh %267 : vector<8x128xf32>
    %276 = vector.extract_strided_slice %274 {offsets = [0, 32], sizes = [8, 32], strides = [1, 1]} : vector<8x128xf32> to vector<8x32xf32>
    %277 = arith.mulf %276, %242 : vector<8x32xf32>
    %278 = vector.extract_strided_slice %274 {offsets = [0, 0], sizes = [8, 32], strides = [1, 1]} : vector<8x128xf32> to vector<8x32xf32>
    %279 = vector.extract_strided_slice %275 {offsets = [0, 64], sizes = [8, 32], strides = [1, 1]} : vector<8x128xf32> to vector<8x32xf32>
    %280 = arith.mulf %278, %279 : vector<8x32xf32>
    %281 = arith.addf %277, %280 : vector<8x32xf32>
    %282 = vector.extract_strided_slice %274 {offsets = [0, 96], sizes = [8, 32], strides = [1, 1]} : vector<8x128xf32> to vector<8x32xf32>
    %283 = math.tanh %281 : vector<8x32xf32>
    %284 = arith.mulf %282, %283 : vector<8x32xf32>
    %cst_68 = arith.constant dense<0.000000e+00> : vector<8x128xf32>
    %285 = tpu.matmul %264, %0, %cst_68 {dimension_numbers = #tpu.dot_dimension_numbers<[1], [0], [0], [1], [0, 0, 1, 1], [], []>} : vector<8x32xf32>, vector<32x128xf32>, vector<8x128xf32> -> vector<8x128xf32>
    %286 = arith.addf %10, %285 : vector<8x128xf32>
    %cst_69 = arith.constant 5.000000e-01 : f32
    %287 = vector.broadcast %cst_69 : f32 to vector<8x128xf32>
    %288 = arith.mulf %287, %286 : vector<8x128xf32>
    %289 = math.tanh %288 : vector<8x128xf32>
    %cst_70 = arith.constant 1.000000e+00 : f32
    %290 = vector.broadcast %cst_70 : f32 to vector<8x128xf32>
    %291 = arith.addf %289, %290 : vector<8x128xf32>
    %cst_71 = arith.constant 5.000000e-01 : f32
    %292 = vector.broadcast %cst_71 : f32 to vector<8x128xf32>
    %293 = arith.mulf %292, %291 : vector<8x128xf32>
    %294 = math.tanh %286 : vector<8x128xf32>
    %295 = vector.extract_strided_slice %293 {offsets = [0, 32], sizes = [8, 32], strides = [1, 1]} : vector<8x128xf32> to vector<8x32xf32>
    %296 = arith.mulf %295, %261 : vector<8x32xf32>
    %297 = vector.extract_strided_slice %293 {offsets = [0, 0], sizes = [8, 32], strides = [1, 1]} : vector<8x128xf32> to vector<8x32xf32>
    %298 = vector.extract_strided_slice %294 {offsets = [0, 64], sizes = [8, 32], strides = [1, 1]} : vector<8x128xf32> to vector<8x32xf32>
    %299 = arith.mulf %297, %298 : vector<8x32xf32>
    %300 = arith.addf %296, %299 : vector<8x32xf32>
    %301 = vector.extract_strided_slice %293 {offsets = [0, 96], sizes = [8, 32], strides = [1, 1]} : vector<8x128xf32> to vector<8x32xf32>
    %302 = math.tanh %300 : vector<8x32xf32>
    %303 = arith.mulf %301, %302 : vector<8x32xf32>
    %304 = tpu.concatenate %303, %284 in 1 : vector<8x32xf32>, vector<8x32xf32> -> vector<8x64xf32>
    %cst_72 = arith.constant dense<0.000000e+00> : vector<8x128xf32>
    %305 = tpu.matmul %304, %1, %cst_72 {dimension_numbers = #tpu.dot_dimension_numbers<[1], [0], [0], [1], [0, 0, 1, 1], [], []>} : vector<8x64xf32>, vector<64x128xf32>, vector<8x128xf32> -> vector<8x128xf32>
    %306 = arith.addf %305, %4 : vector<8x128xf32>
    %cst_73 = arith.constant 5.000000e-01 : f32
    %307 = vector.broadcast %cst_73 : f32 to vector<8x128xf32>
    %308 = arith.mulf %307, %306 : vector<8x128xf32>
    %309 = math.tanh %308 : vector<8x128xf32>
    %cst_74 = arith.constant 1.000000e+00 : f32
    %310 = vector.broadcast %cst_74 : f32 to vector<8x128xf32>
    %311 = arith.addf %309, %310 : vector<8x128xf32>
    %cst_75 = arith.constant 5.000000e-01 : f32
    %312 = vector.broadcast %cst_75 : f32 to vector<8x128xf32>
    %313 = arith.mulf %312, %311 : vector<8x128xf32>
    %314 = math.tanh %306 : vector<8x128xf32>
    %315 = vector.extract_strided_slice %313 {offsets = [0, 32], sizes = [8, 32], strides = [1, 1]} : vector<8x128xf32> to vector<8x32xf32>
    %316 = arith.mulf %315, %281 : vector<8x32xf32>
    %317 = vector.extract_strided_slice %313 {offsets = [0, 0], sizes = [8, 32], strides = [1, 1]} : vector<8x128xf32> to vector<8x32xf32>
    %318 = vector.extract_strided_slice %314 {offsets = [0, 64], sizes = [8, 32], strides = [1, 1]} : vector<8x128xf32> to vector<8x32xf32>
    %319 = arith.mulf %317, %318 : vector<8x32xf32>
    %320 = arith.addf %316, %319 : vector<8x32xf32>
    %321 = vector.extract_strided_slice %313 {offsets = [0, 96], sizes = [8, 32], strides = [1, 1]} : vector<8x128xf32> to vector<8x32xf32>
    %322 = math.tanh %320 : vector<8x32xf32>
    %323 = arith.mulf %321, %322 : vector<8x32xf32>
    %324 = tpu.concatenate %50, %89, %128, %167, %206, %245, %284, %323 in 0 : vector<8x32xf32>, vector<8x32xf32>, vector<8x32xf32>, vector<8x32xf32>, vector<8x32xf32>, vector<8x32xf32>, vector<8x32xf32>, vector<8x32xf32> -> vector<64x32xf32>
    %c0_76 = arith.constant 0 : index
    %c0_77 = arith.constant 0 : index
    %325 = vector.load %arg6[%c0_76, %c0_77] : memref<32x128xf32, #tpu.memory_space<vmem>>, vector<32x128xf32>
    %cst_78 = arith.constant dense<0.000000e+00> : vector<64x128xf32>
    %326 = tpu.matmul %324, %325, %cst_78 {dimension_numbers = #tpu.dot_dimension_numbers<[1], [0], [0], [1], [0, 0, 1, 1], [], []>} : vector<64x32xf32>, vector<32x128xf32>, vector<64x128xf32> -> vector<64x128xf32>
    %c0_79 = arith.constant 0 : index
    %c0_80 = arith.constant 0 : index
    %327 = vector.load %arg7[%c0_79, %c0_80] : memref<1x128xf32, #tpu.memory_space<vmem>>, vector<1x128xf32>
    %328 = vector.broadcast %327 : vector<1x128xf32> to vector<64x128xf32>
    %329 = arith.addf %326, %328 : vector<64x128xf32>
    %330 = vector.shape_cast %329 : vector<64x128xf32> to vector<8x8x128xf32>
    %c0_81 = arith.constant 0 : index
    %c0_82 = arith.constant 0 : index
    %c0_83 = arith.constant 0 : index
    %331 = vector.load %arg8[%c0_81, %c0_82, %c0_83] : memref<8x8x128xf32, #tpu.memory_space<vmem>>, vector<8x8x128xf32>
    tpu.vector_store %arg8[%c0_81, %c0_82, %c0_83], %330 {strides = array<i32>} : memref<8x8x128xf32, #tpu.memory_space<vmem>>, vector<8x8x128xf32>,
    return
  }
}

</mosaic_0001>

<bundles_post_ra>
// kernel: tpu_custom_call.1
= control target key start
LH: loop header
LB: loop body
LE: loop exit
PB: predicated region body
PF: predicated region fallthrough
CT: control target
= control target key end

     0   :  { %13 = vsyncpa [#allocation3], 0  ;;  %s3267_s0 = inlined_call_operand.hbm [shape: f32[8,16], index: 0, kind: input, shape index: {}]   ;;  %s3268_s1 = inlined_call_operand.hbm [shape: f32[16,128], index: 1, kind: input, shape index: {}]   ;;  %s3269_s2 = inlined_call_operand.hbm [shape: f32[32,128], index: 2, kind: input, shape index: {}]   ;;  %s3270_s3 = inlined_call_operand.vmem [shape: f32[1,128], index: 3, kind: input, shape index: {}]   ;;  %s3271_s4 = inlined_call_operand.hbm [shape: f32[64,128], index: 4, kind: input, shape index: {}]   ;;  %s3272_s5 = inlined_call_operand.vmem [shape: f32[1,128], index: 5, kind: input, shape index: {}]   ;;  %s3273_s6 = inlined_call_operand.hbm [shape: f32[32,128], index: 6, kind: input, shape index: {}]   ;;  %s3274_s7 = inlined_call_operand.vmem [shape: f32[1,128], index: 7, kind: input, shape index: {}]   ;;  %s3275_s8 = inlined_call_operand.hbm [shape: f32[8,8,128], index: 8, kind: output, shape index: {}]  }
   0x1   :  { %14 = vsyncpa [#allocation6], 0 }
   0x2   :  { %15 = vsyncpa [#allocation9], 0 }
   0x3   :  { %16 = vsyncpa [#allocation4], 0  ;;  %s2791_s27 = smov [#allocation5]   ;;  %s2651_s9 = scalar_lea.hbm %s3268_s1, 256 }
   0x4   :  { %s32_s28 = sshll.u32 %s2791_s27, 4  ;;  %p2652_p0 = scmp.ne.s32.totalorder %s3268_s1, %s2651_s9  ;;  %s33_s28 = int_to_ptr.vmem [resolvable:$true] %s32_s28 }
   0x5   :  { %p2655_p1 = scmp.lt.u32.totalorder %s2651_s9, %s3268_s1 }
   0x7   :  { %p2657_p2 = pnand %p2655_p1, %p2652_p0 }
   0x9   :  { %2660 = shalt.err (!%p2657_p2)
}
   0xa   :  { %s2661_s14 = scalar_lea.vmem %s33_s28, 256  ;;  %p2666_p4 = scmp.lt.s32.totalorder %s33_s28, %s33_s28 }
   0xb   :  { %p2662_p3 = scmp.ne.s32.totalorder %s33_s28, %s2661_s14  ;;  %p2667_p5 = scmp.lt.s32.totalorder %s2661_s14, %s2661_s14 }
   0xd   :  { %p2668_p6 = por %p2667_p5, %p2666_p4 }
   0xf   :  { %p2669_p7 = pnand %p2668_p6, %p2662_p3 }
  0x11   :  { %2672 = shalt.err (!%p2669_p7)
}
  0x12   :  { %s2792_s15 = smov 128   ;;  %s2793_s16 = smov 8  }
  0x13   :  { %38 = dma.hbm_to_vmem [thread:$0]  %s3268_s1, 256, %s33_s28, [#allocation6], %s2792_s15, %s2792_s15, %s2793_s16  }
  0x14   :  { %s2794_s19 = smov [#allocation8]   ;;  %s2795_s21 = smov [#allocation2]  }
  0x15   :  { %s58_s20 = sshll.u32 %s2794_s19, 4  ;;  %s23_s22 = sshll.u32 %s2795_s21, 4  ;;  %s59_s20 = int_to_ptr.vmem [resolvable:$true] %s58_s20  ;;  %s24_s22 = int_to_ptr.vmem [resolvable:$true] %s23_s22 }
  0x16   :  { %s2673_s25 = scalar_lea.hbm %s3271_s4, 1024 }
  0x17   :  { %p2674_p8 = scmp.ne.s32.totalorder %s3271_s4, %s2673_s25  ;;  %p2677_p9 = scmp.lt.u32.totalorder %s2673_s25, %s3271_s4 }
  0x19   :  { %p2679_p10 = pnand %p2677_p9, %p2674_p8 }
  0x1b   :  { %2682 = shalt.err (!%p2679_p10)
}
  0x1c   :  { %s2683_s1 = scalar_lea.vmem %s59_s20, 1024  ;;  %p2688_p12 = scmp.lt.s32.totalorder %s59_s20, %s59_s20 }
  0x1d   :  { %p2684_p11 = scmp.ne.s32.totalorder %s59_s20, %s2683_s1  ;;  %p2689_p13 = scmp.lt.s32.totalorder %s2683_s1, %s2683_s1 }
  0x1f   :  { %p2690_p0 = por %p2689_p13, %p2688_p12 }
  0x21   :  { %p2691_p1 = pnand %p2690_p0, %p2684_p11 }
  0x23   :  { %2694 = shalt.err (!%p2691_p1)
}
  0x24   :  { %64 = dma.hbm_to_vmem [thread:$0]  %s3271_s4, 1024, %s59_s20, [#allocation9], %s2792_s15, %s2792_s15, %s2793_s16  }
  0x25   :  { %s2695_s12 = scalar_lea.hbm %s3267_s0, 128 }
  0x26   :  { %p2696_p2 = scmp.ne.s32.totalorder %s3267_s0, %s2695_s12  ;;  %p2699_p3 = scmp.lt.u32.totalorder %s2695_s12, %s3267_s0 }
  0x28   :  { %p2701_p4 = pnand %p2699_p3, %p2696_p2 }
  0x2a   :  { %2704 = shalt.err (!%p2701_p4)
}
  0x2b   :  { %s2705_s19 = scalar_lea.vmem %s24_s22, 128  ;;  %p2710_p6 = scmp.lt.s32.totalorder %s24_s22, %s24_s22 }
  0x2c   :  { %p2706_p5 = scmp.ne.s32.totalorder %s24_s22, %s2705_s19  ;;  %p2711_p7 = scmp.lt.s32.totalorder %s2705_s19, %s2705_s19 }
  0x2e   :  { %p2712_p8 = por %p2711_p7, %p2710_p6 }
  0x30   :  { %p2713_p9 = pnand %p2712_p8, %p2706_p5 }
  0x32   :  { %2716 = shalt.err (!%p2713_p9)
}
  0x33   :  { %26 = dma.hbm_to_vmem [thread:$0]  %s3267_s0, 128, %s24_s22, [#allocation3]  }
  0x34   :  { %s2796_s21 = smov [#allocation7]   ;;  %s2797_s24 = smov [#allocation10]  }
  0x35   :  { %s44_s23 = sshll.u32 %s2796_s21, 4  ;;  %s72_s25 = sshll.u32 %s2797_s24, 4  ;;  %s45_s23 = int_to_ptr.vmem [resolvable:$true] %s44_s23  ;;  %s73_s25 = int_to_ptr.vmem [resolvable:$true] %s72_s25 }
  0x36   :  { %s2717_s29 = scalar_lea.hbm %s3269_s2, 512 }
  0x37   :  { %p2718_p10 = scmp.ne.s32.totalorder %s3269_s2, %s2717_s29  ;;  %p2721_p11 = scmp.lt.u32.totalorder %s2717_s29, %s3269_s2 }
  0x39   :  { %p2723_p12 = pnand %p2721_p11, %p2718_p10 }
  0x3b   :  { %2726 = shalt.err (!%p2723_p12)
}
  0x3c   :  { %s2727_s0 = scalar_lea.vmem %s45_s23, 512  ;;  %p2732_p0 = scmp.lt.s32.totalorder %s45_s23, %s45_s23 }
  0x3d   :  { %p2728_p13 = scmp.ne.s32.totalorder %s45_s23, %s2727_s0  ;;  %p2733_p1 = scmp.lt.s32.totalorder %s2727_s0, %s2727_s0 }
  0x3f   :  { %p2734_p2 = por %p2733_p1, %p2732_p0 }
  0x41   :  { %p2735_p3 = pnand %p2734_p2, %p2728_p13 }
  0x43   :  { %2738 = shalt.err (!%p2735_p3)
}
  0x44   :  { %50 = dma.hbm_to_vmem [thread:$0]  %s3269_s2, 512, %s45_s23, [#allocation6], %s2792_s15, %s2792_s15, %s2793_s16  }
  0x45   :  { %s2739_s13 = scalar_lea.hbm %s3273_s6, 512 }
  0x46   :  { %p2740_p4 = scmp.ne.s32.totalorder %s3273_s6, %s2739_s13  ;;  %p2743_p5 = scmp.lt.u32.totalorder %s2739_s13, %s3273_s6 }
  0x48   :  { %p2745_p6 = pnand %p2743_p5, %p2740_p4 }
  0x4a   :  { %2748 = shalt.err (!%p2745_p6)
}
  0x4b   :  { %s2749_s4 = scalar_lea.vmem %s73_s25, 512  ;;  %p2754_p8 = scmp.lt.s32.totalorder %s73_s25, %s73_s25 }
  0x4c   :  { %p2750_p7 = scmp.ne.s32.totalorder %s73_s25, %s2749_s4  ;;  %p2755_p9 = scmp.lt.s32.totalorder %s2749_s4, %s2749_s4 }
  0x4e   :  { %p2756_p10 = por %p2755_p9, %p2754_p8 }
  0x50   :  { %p2757_p11 = pnand %p2756_p10, %p2750_p7 }
  0x52   :  { %2760 = shalt.err (!%p2757_p11)
}
  0x53   :  { %78 = dma.hbm_to_vmem [thread:$0]  %s3273_s6, 512, %s73_s25, [#allocation9], %s2792_s15, %s2792_s15, %s2793_s16  }
  0x54   :  { %2783 = dma.done.wait [#allocation3], 128  }
  0x55   :  { %2784 = vsyncadd [#allocation3], 4294967168 }
  0x56   :  { %2785 = dma.done.wait [#allocation6], 768  }
  0x57   :  { %2786 = vsyncadd [#allocation6], 4294966528 }
  0x58   :  { %2787 = dma.done.wait [#allocation9], 1536  }
  0x59   :  { %2788 = vsyncadd [#allocation9], 4294965760  ;;  %v2798_v0 = vmov 0.0|0.0   ;;  %vm2799_vm0 = vmmov 0   ;;  %v2800_v1 = vmov 0.0   ;;  %v116_v2 = vld [vmem:[#allocation5] sm:$0xff] }
  0x5a   :  { %2387 = vmatprep.subr.bf16.mxu1 %v2798_v0  ;;  %2124 = vmatprep.mubr.msk.f32.mxu1 %vm2799_vm0, %v2800_v1  ;;  %v117_v3 = vld [vmem:[#allocation5 + $0x8] sm:$0xff]  ;;  %v96_v5 = vld [vmem:[#allocation7] sm:$0xff]  ;;  %v97_v6 = vld [vmem:[#allocation7 + $0x8] sm:$0xff]  ;;  %vm125_vm1 = vcmask 130048   ;;  %s2801_s23 = smov 64   ;;  %s2802_s24 = smov 32  }
  0x5b   :  { %2396 = vmatprep.subr.bf16.mxu0 %v2798_v0  ;;  %2154 = vmatprep.mubr.msk.f32.mxu0 %vm2799_vm0, %v2800_v1  ;;  %v2388_v4 = vpack.c.bf16 %v117_v3, %v116_v2  ;;  %v115_v7 = vld [vmem:[#allocation2] sm:$0xff]  ;;  %v2927_v8 = vpack.c.bf16 %v97_v6, %v96_v5  ;;  %v98_v9 = vld [vmem:[#allocation7 + $0x10] sm:$0xff]  ;;  %v99_v10 = vld [vmem:[#allocation7 + $0x18] sm:$0xff]  ;;  %vm199_vm2 = vcmask 261120   ;;  %vm301_vm3 = vcmask 523264   ;;  %s2803_s27 = smov [#allocation11]  }
  0x5c   :  { %v2931_v11 = vpack.c.bf16 %v99_v10, %v98_v9  ;;  %v1967_v14 = vld [vmem:[%s3270_s3] ss:$0 sm:$0xff]  ;;  %v100_v29 = vld [vmem:[#allocation8] sm:$0xff]  ;;  %v102_v31 = vld [vmem:[#allocation8 + $0x10] sm:$0xff] }
  0x5d   :  { %2389 = vmatpush3.bf16.msra.mxu1 %v2388_v4  ;;  %v101_v30 = vld [vmem:[#allocation8 + $0x8] sm:$0xff]  ;;  %v103_v33 = vld [vmem:[#allocation8 + $0x18] sm:$0xff]  ;;  %v104_v35 = vld [vmem:[#allocation8 + $0x20] sm:$0xff] }
  0x5e   :  { %2390 = vmatprep.subr.bf16.mxu1 %v2798_v0  ;;  %v2956_v32 = vpack.c.bf16 %v101_v30, %v100_v29  ;;  %v2959_v34 = vpack.c.bf16 %v103_v33, %v102_v31  ;;  %v105_v36 = vld [vmem:[#allocation8 + $0x28] sm:$0xff]  ;;  %v106_v38 = vld [vmem:[#allocation8 + $0x30] sm:$0xff]  ;;  %v107_v39 = vld [vmem:[#allocation8 + $0x38] sm:$0xff] }
  0x5f   :  { %v2963_v37 = vpack.c.bf16 %v105_v36, %v104_v35  ;;  %v2968_v41 = vpack.c.bf16 %v107_v39, %v106_v38  ;;  %v2996_v46 = vld [vmem:[%s3272_s5] ss:$0 sm:$0xff] }
  0x60   :  { %2125 = vmatmul.mubr.msk.f32.vlgmr.msra.gmra.mrb[0].mxu1 %vm125_vm1, %v115_v7  ;;  %2398 = vmatpush3.bf16.msra.mxu0 %v2956_v32 }
  0x61   :  { %2392 = vmatpush3.bf16.msra.mxu1 %v2927_v8  ;;  %2135 = vmatprep.mubr.msk.f32.mxu1 %vm2799_vm0, %v2800_v1 }
  0x62   :  { %2393 = vmatprep.subr.bf16.mxu1 %v2798_v0  ;;  %2399 = vmatprep.subr.bf16.mxu0 %v2798_v0 }
  0x64   :  { %2401 = vmatpush3.bf16.msra.mxu0 %v2959_v34 }
  0x65   :  { %2395 = vmatpush3.bf16.msra.mxu1 %v2931_v11  ;;  %2402 = vmatprep.subr.bf16.mxu0 %v2798_v0 }
  0x66   :  { %2408 = vmatprep.subr.bf16.mxu1 %v2798_v0 }
  0x68   :  { %2136 = vmatmul.mubr.f32.vlgmr.msra.gmra.mrb[2].mxu1 %v2800_v1  ;;  %2404 = vmatpush3.bf16.msra.mxu0 %v2963_v37 }
  0x69   :  { %2410 = vmatpush3.bf16.msra.mxu1 %v2927_v8  ;;  %2165 = vmatprep.mubr.msk.f32.mxu1 %vm2799_vm0, %v2800_v1 }
  0x6a   :  { %2411 = vmatprep.subr.bf16.mxu1 %v2798_v0  ;;  %2405 = vmatprep.subr.bf16.mxu0 %v2798_v0 }
  0x6c   :  { %2407 = vmatpush3.bf16.msra.mxu0 %v2968_v41 }
  0x6d   :  { %2413 = vmatpush3.bf16.msra.mxu1 %v2931_v11  ;;  %2426 = vmatprep.subr.bf16.mxu0 %v2798_v0 }
  0x6e   :  { %2414 = vmatprep.subr.bf16.mxu1 %v2798_v0 }
 0x133   :  { %v195_v12 = vpop.f32.mrb[0].mxu1 }
 0x134   :  { %v2126_v13 = vpop.f32.mrb[1].mxu1  ;;  %v2948_v15 = vadd.f32 %v1967_v14, %v195_v12 }
 0x13b   :  { %v269_v16 = vpop.f32.mrb[2].mxu1 }
 0x13c   :  { %v273_v17 = vadd.f32 %v269_v16, %v2948_v15  ;;  %v2137_v18 = vpop.f32.mrb[3].mxu1 }
 0x13e   :  { %2555 = vtanh.f32 %v273_v17  ;;  %v274_v20 = vmul.f32 0.5, %v273_v17 }
 0x140   :  { %2557 = vtanh.f32 %v274_v20 }
 0x148   :  { %v2556_v19 = vpop.eup %2555 }
 0x149   :  { %281 = vrot.lane.b32.xlu0 %v2556_v19, %s2801_s23 }
 0x14a   :  { %v2558_v21 = vpop.eup %2557 }
 0x14b   :  { %v276_v22 = vadd.f32 1.0, %v2558_v21 }
 0x14d   :  { %v277_v23 = vmul.f32 0.5, %v276_v22 }
 0x14f   :  { %v279_v26 = vmul.f32 0.0, %v277_v23 }
 0x1bb   :  { %v282_v24 = vpop.permute.xlu0 %281 }
 0x1bc   :  { %v284_v25 = vmul.f32 %v282_v24, %v277_v23 }
 0x1be   :  { %286 = vrot.lane.b32.xlu0 %v284_v25, %s2802_s24 }
 0x230   :  { %v287_v27 = vpop.permute.xlu0 %286 }
 0x231   :  { %v2953_v28 = vadd.f32 %v287_v27, %v279_v26 }
 0x233   :  { %2559 = vtanh.f32 %v2953_v28 }
 0x23d   :  { %v2560_v40 = vpop.eup %2559 }
 0x23e   :  { %292 = vrot.lane.b32.xlu1 %v2560_v40, %s2801_s23 }
 0x2b0   :  { %v293_v42 = vpop.permute.xlu1 %292 }
 0x2b1   :  { %v295_v43 = vmul.f32 %v293_v42, %v277_v23 }
 0x2b3   :  { %297 = vrot.lane.b32.xlu1 %v295_v43, %s2802_s24 }
 0x325   :  { %v298_v44 = vpop.permute.xlu1 %297 }
 0x326   :  { %v300_v45 = vsel %vm199_vm2, %v298_v44, 0.0  ;;  %2166 = vmatmul.mubr.msk.f32.vlgmr.msra.gmra.mrb[4].mxu1 %vm199_vm2, %v298_v44 }
 0x327   :  { %2155 = vmatmul.mubr.msk.f32.vlgmr.msra.gmra.mrb[0].mxu0 %vm301_vm3, %v300_v45  ;;  %2416 = vmatpush3.bf16.msra.mxu1 %v2956_v32 }
 0x328   :  { %2417 = vmatprep.subr.bf16.mxu1 %v2798_v0  ;;  %2428 = vmatpush3.bf16.msra.mxu0 %v2927_v8 }
 0x329   :  { %2429 = vmatprep.subr.bf16.mxu0 %v2798_v0  ;;  %2195 = vmatprep.mubr.msk.f32.mxu0 %vm2799_vm0, %v2800_v1 }
 0x32a   :  { %2184 = vmatprep.mubr.msk.f32.mxu1 %vm2799_vm0, %v2800_v1 }
 0x32b   :  { %2419 = vmatpush3.bf16.msra.mxu1 %v2959_v34 }
 0x32c   :  { %2420 = vmatprep.subr.bf16.mxu1 %v2798_v0  ;;  %2431 = vmatpush3.bf16.msra.mxu0 %v2931_v11 }
 0x32d   :  { %2432 = vmatprep.subr.bf16.mxu0 %v2798_v0 }
 0x32f   :  { %2422 = vmatpush3.bf16.msra.mxu1 %v2963_v37 }
 0x330   :  { %2423 = vmatprep.subr.bf16.mxu1 %v2798_v0 }
 0x333   :  { %2425 = vmatpush3.bf16.msra.mxu1 %v2968_v41 }
 0x334   :  { %2444 = vmatprep.subr.bf16.mxu1 %v2798_v0 }
 0x3f9   :  { %v465_v47 = vpop.f32.mrb[4].mxu1 }
 0x3fa   :  { %v469_v48 = vadd.f32 %v465_v47, %v2948_v15  ;;  %v371_v49 = vpop.f32.mrb[0].mxu0  ;;  %v2167_v50 = vpop.f32.mrb[5].mxu1 }
 0x3fb   :  { %v372_v51 = vadd.f32 %v2996_v46, %v371_v49  ;;  %v2156_v52 = vpop.f32.mrb[1].mxu0 }
 0x3fc   :  { %2561 = vtanh.f32 %v469_v48  ;;  %v470_v55 = vmul.f32 0.5, %v469_v48 }
 0x3fd   :  { %2563 = vtanh.f32 %v372_v51  ;;  %v375_v56 = vmul.f32 0.5, %v372_v51 }
 0x3fe   :  { %2565 = vtanh.f32 %v470_v55 }
 0x3ff   :  { %2567 = vtanh.f32 %v375_v56 }
 0x406   :  { %v2562_v53 = vpop.eup %2561 }
 0x407   :  { %v2564_v54 = vpop.eup %2563  ;;  %477 = vrot.lane.b32.xlu1 %v2562_v53, %s2801_s23 }
 0x408   :  { %382 = vrot.lane.b32.xlu0 %v2564_v54, %s2801_s23  ;;  %v2566_v57 = vpop.eup %2565 }
 0x409   :  { %v2568_v58 = vpop.eup %2567  ;;  %v472_v59 = vadd.f32 1.0, %v2566_v57 }
 0x40a   :  { %v377_v60 = vadd.f32 1.0, %v2568_v58 }
 0x40b   :  { %v473_v61 = vmul.f32 0.5, %v472_v59 }
 0x40c   :  { %v378_v63 = vmul.f32 0.5, %v377_v60 }
 0x40d   :  { %v475_v5 = vmul.f32 %v473_v61, %v2953_v28 }
 0x40e   :  { %v380_v7 = vmul.f32 0.0, %v378_v63 }
 0x479   :  { %v478_v62 = vpop.permute.xlu1 %477 }
 0x47a   :  { %v480_v2 = vmul.f32 %v478_v62, %v473_v61  ;;  %v383_v3 = vpop.permute.xlu0 %382 }
 0x47b   :  { %v385_v4 = vmul.f32 %v383_v3, %v378_v63 }
 0x47c   :  { %482 = vrot.lane.b32.xlu1 %v480_v2, %s2802_s24 }
 0x47d   :  { %387 = vrot.lane.b32.xlu0 %v385_v4, %s2802_s24 }
 0x4ee   :  { %v483_v6 = vpop.permute.xlu1 %482 }
 0x4ef   :  { %v485_v9 = vadd.f32 %v483_v6, %v475_v5  ;;  %v388_v10 = vpop.permute.xlu0 %387 }
 0x4f0   :  { %v3005_v12 = vadd.f32 %v388_v10, %v380_v7 }
 0x4f1   :  { %2569 = vtanh.f32 %v485_v9 }
 0x4f2   :  { %2571 = vtanh.f32 %v3005_v12 }
 0x4fb   :  { %v2570_v13 = vpop.eup %2569 }
 0x4fc   :  { %v2572_v14 = vpop.eup %2571  ;;  %488 = vrot.lane.b32.xlu1 %v2570_v13, %s2801_s23 }
 0x4fd   :  { %393 = vrot.lane.b32.xlu0 %v2572_v14, %s2801_s23 }
 0x56e   :  { %v489_v16 = vpop.permute.xlu1 %488 }
 0x56f   :  { %v491_v17 = vmul.f32 %v489_v16, %v473_v61  ;;  %v394_v18 = vpop.permute.xlu0 %393 }
 0x570   :  { %v3010_v19 = vmul.f32 %v394_v18, %v378_v63 }
 0x571   :  { %493 = vrot.lane.b32.xlu0 %v491_v17, %s2802_s24 }
 0x572   :  { %497 = vrot.lane.b32.xlu1 %v3010_v19, %s2801_s23 }
 0x5e3   :  { %v494_v20 = vpop.permute.xlu0 %493 }
 0x5e4   :  { %2196 = vmatmul.mubr.msk.f32.vlgmr.msra.gmra.mrb[2].mxu0 %vm199_vm2, %v494_v20  ;;  %v498_v21 = vpop.permute.xlu1 %497 }
 0x5e5   :  { %v500_v22 = vsel %vm199_vm2, %v494_v20, %v498_v21  ;;  %2434 = vmatpush3.bf16.msra.mxu0 %v2956_v32  ;;  %2214 = vmatprep.mubr.msk.f32.mxu0 %vm2799_vm0, %v2800_v1 }
 0x5e6   :  { %2185 = vmatmul.mubr.msk.f32.vlgmr.msra.gmra.mrb[6].mxu1 %vm301_vm3, %v500_v22  ;;  %2435 = vmatprep.subr.bf16.mxu0 %v2798_v0 }
 0x5e7   :  { %2446 = vmatpush3.bf16.msra.mxu1 %v2927_v8  ;;  %2225 = vmatprep.mubr.msk.f32.mxu1 %vm2799_vm0, %v2800_v1 }
 0x5e8   :  { %2447 = vmatprep.subr.bf16.mxu1 %v2798_v0 }
 0x5e9   :  { %2437 = vmatpush3.bf16.msra.mxu0 %v2959_v34 }
 0x5ea   :  { %2438 = vmatprep.subr.bf16.mxu0 %v2798_v0 }
 0x5eb   :  { %2449 = vmatpush3.bf16.msra.mxu1 %v2931_v11 }
 0x5ec   :  { %2450 = vmatprep.subr.bf16.mxu1 %v2798_v0 }
 0x5ed   :  { %2440 = vmatpush3.bf16.msra.mxu0 %v2963_v37 }
 0x5ee   :  { %2441 = vmatprep.subr.bf16.mxu0 %v2798_v0 }
 0x5f1   :  { %2443 = vmatpush3.bf16.msra.mxu0 %v2968_v41 }
 0x5f2   :  { %2462 = vmatprep.subr.bf16.mxu0 %v2798_v0 }
 0x6b7   :  { %v664_v23 = vpop.f32.mrb[2].mxu0 }
 0x6b8   :  { %v668_v24 = vadd.f32 %v664_v23, %v2948_v15  ;;  %v2197_v25 = vpop.f32.mrb[3].mxu0 }
 0x6b9   :  { %v570_v26 = vpop.f32.mrb[6].mxu1 }
 0x6ba   :  { %2573 = vtanh.f32 %v668_v24  ;;  %v571_v27 = vadd.f32 %v2996_v46, %v570_v26  ;;  %v2186_v28 = vpop.f32.mrb[7].mxu1  ;;  %v669_v31 = vmul.f32 0.5, %v668_v24 }
 0x6bc   :  { %2575 = vtanh.f32 %v571_v27  ;;  %v574_v33 = vmul.f32 0.5, %v571_v27 }
 0x6bd   :  { %2577 = vtanh.f32 %v669_v31 }
 0x6be   :  { %2579 = vtanh.f32 %v574_v33 }
 0x6c4   :  { %v2574_v29 = vpop.eup %2573 }
 0x6c5   :  { %676 = vrot.lane.b32.xlu1 %v2574_v29, %s2801_s23 }
 0x6c6   :  { %v2576_v30 = vpop.eup %2575 }
 0x6c7   :  { %581 = vrot.lane.b32.xlu0 %v2576_v30, %s2801_s23  ;;  %v2578_v35 = vpop.eup %2577 }
 0x6c8   :  { %v2580_v36 = vpop.eup %2579  ;;  %v671_v38 = vadd.f32 1.0, %v2578_v35 }
 0x6c9   :  { %v576_v39 = vadd.f32 1.0, %v2580_v36 }
 0x6ca   :  { %v672_v40 = vmul.f32 0.5, %v671_v38 }
 0x6cb   :  { %v577_v44 = vmul.f32 0.5, %v576_v39 }
 0x6cc   :  { %v674_v48 = vmul.f32 %v672_v40, %v485_v9 }
 0x6cd   :  { %v579_v51 = vmul.f32 %v577_v44, %v3005_v12 }
 0x737   :  { %v677_v42 = vpop.permute.xlu1 %676 }
 0x738   :  { %v679_v43 = vmul.f32 %v677_v42, %v672_v40 }
 0x739   :  { %v582_v45 = vpop.permute.xlu0 %581 }
 0x73a   :  { %681 = vrot.lane.b32.xlu1 %v679_v43, %s2802_s24  ;;  %v584_v47 = vmul.f32 %v582_v45, %v577_v44 }
 0x73c   :  { %586 = vrot.lane.b32.xlu0 %v584_v47, %s2802_s24 }
 0x7ac   :  { %v682_v49 = vpop.permute.xlu1 %681 }
 0x7ad   :  { %v3040_v50 = vadd.f32 %v682_v49, %v674_v48 }
 0x7ae   :  { %v587_v52 = vpop.permute.xlu0 %586 }
 0x7af   :  { %2581 = vtanh.f32 %v3040_v50  ;;  %v3044_v53 = vadd.f32 %v587_v52, %v579_v51 }
 0x7b1   :  { %2583 = vtanh.f32 %v3044_v53 }
 0x7b9   :  { %v2582_v54 = vpop.eup %2581 }
 0x7ba   :  { %687 = vrot.lane.b32.xlu1 %v2582_v54, %s2801_s23 }
 0x7bb   :  { %v2584_v55 = vpop.eup %2583 }
 0x7bc   :  { %592 = vrot.lane.b32.xlu0 %v2584_v55, %s2801_s23 }
 0x82c   :  { %v688_v56 = vpop.permute.xlu1 %687 }
 0x82d   :  { %v690_v57 = vmul.f32 %v688_v56, %v672_v40 }
 0x82e   :  { %v593_v58 = vpop.permute.xlu0 %592 }
 0x82f   :  { %692 = vrot.lane.b32.xlu0 %v690_v57, %s2802_s24  ;;  %v3050_v59 = vmul.f32 %v593_v58, %v577_v44 }
 0x831   :  { %696 = vrot.lane.b32.xlu1 %v3050_v59, %s2801_s23 }
 0x8a1   :  { %v693_v60 = vpop.permute.xlu0 %692 }
 0x8a2   :  { %2226 = vmatmul.mubr.msk.f32.vlgmr.msra.gmra.mrb[8].mxu1 %vm199_vm2, %v693_v60 }
 0x8a3   :  { %2452 = vmatpush3.bf16.msra.mxu1 %v2956_v32  ;;  %2244 = vmatprep.mubr.msk.f32.mxu1 %vm2799_vm0, %v2800_v1  ;;  %v697_v61 = vpop.permute.xlu1 %696 }
 0x8a4   :  { %2453 = vmatprep.subr.bf16.mxu1 %v2798_v0  ;;  %v699_v62 = vsel %vm199_vm2, %v693_v60, %v697_v61 }
 0x8a5   :  { %2215 = vmatmul.mubr.msk.f32.vlgmr.msra.gmra.mrb[4].mxu0 %vm301_vm3, %v699_v62 }
 0x8a6   :  { %2464 = vmatpush3.bf16.msra.mxu0 %v2927_v8  ;;  %2255 = vmatprep.mubr.msk.f32.mxu0 %vm2799_vm0, %v2800_v1 }
 0x8a7   :  { %2455 = vmatpush3.bf16.msra.mxu1 %v2959_v34  ;;  %2465 = vmatprep.subr.bf16.mxu0 %v2798_v0 }
 0x8a8   :  { %2456 = vmatprep.subr.bf16.mxu1 %v2798_v0 }
 0x8aa   :  { %2467 = vmatpush3.bf16.msra.mxu0 %v2931_v11 }
 0x8ab   :  { %2458 = vmatpush3.bf16.msra.mxu1 %v2963_v37  ;;  %2468 = vmatprep.subr.bf16.mxu0 %v2798_v0 }
 0x8ac   :  { %2459 = vmatprep.subr.bf16.mxu1 %v2798_v0 }
 0x8af   :  { %2461 = vmatpush3.bf16.msra.mxu1 %v2968_v41 }
 0x8b0   :  { %2480 = vmatprep.subr.bf16.mxu1 %v2798_v0 }
 0x975   :  { %v863_v63 = vpop.f32.mrb[8].mxu1 }
 0x976   :  { %v867_v2 = vadd.f32 %v863_v63, %v2948_v15  ;;  %v2227_v3 = vpop.f32.mrb[9].mxu1 }
 0x978   :  { %2585 = vtanh.f32 %v867_v2  ;;  %v769_v4 = vpop.f32.mrb[4].mxu0  ;;  %v868_v10 = vmul.f32 0.5, %v867_v2 }
 0x979   :  { %v770_v5 = vadd.f32 %v2996_v46, %v769_v4  ;;  %v2216_v6 = vpop.f32.mrb[5].mxu0 }
 0x97b   :  { %2587 = vtanh.f32 %v770_v5  ;;  %v773_v12 = vmul.f32 0.5, %v770_v5 }
 0x97c   :  { %2589 = vtanh.f32 %v868_v10 }
 0x97d   :  { %2591 = vtanh.f32 %v773_v12 }
 0x982   :  { %v2586_v7 = vpop.eup %2585 }
 0x983   :  { %875 = vrot.lane.b32.xlu1 %v2586_v7, %s2801_s23 }
 0x985   :  { %v2588_v9 = vpop.eup %2587 }
 0x986   :  { %780 = vrot.lane.b32.xlu0 %v2588_v9, %s2801_s23  ;;  %v2590_v13 = vpop.eup %2589 }
 0x987   :  { %v870_v14 = vadd.f32 1.0, %v2590_v13  ;;  %v2592_v16 = vpop.eup %2591 }
 0x988   :  { %v775_v18 = vadd.f32 1.0, %v2592_v16 }
 0x989   :  { %v871_v17 = vmul.f32 0.5, %v870_v14 }
 0x98a   :  { %v776_v22 = vmul.f32 0.5, %v775_v18 }
 0x98b   :  { %v873_v25 = vmul.f32 %v871_v17, %v3040_v50 }
 0x98c   :  { %v778_v28 = vmul.f32 %v776_v22, %v3044_v53 }
 0x9f5   :  { %v876_v20 = vpop.permute.xlu1 %875 }
 0x9f6   :  { %v878_v21 = vmul.f32 %v876_v20, %v871_v17 }
 0x9f8   :  { %880 = vrot.lane.b32.xlu1 %v878_v21, %s2802_s24  ;;  %v781_v23 = vpop.permute.xlu0 %780 }
 0x9f9   :  { %v783_v24 = vmul.f32 %v781_v23, %v776_v22 }
 0x9fb   :  { %785 = vrot.lane.b32.xlu0 %v783_v24, %s2802_s24 }
 0xa6a   :  { %v881_v26 = vpop.permute.xlu1 %880 }
 0xa6b   :  { %v3080_v27 = vadd.f32 %v881_v26, %v873_v25 }
 0xa6d   :  { %2593 = vtanh.f32 %v3080_v27  ;;  %v786_v29 = vpop.permute.xlu0 %785 }
 0xa6e   :  { %v3084_v30 = vadd.f32 %v786_v29, %v778_v28 }
 0xa70   :  { %2595 = vtanh.f32 %v3084_v30 }
 0xa77   :  { %v2594_v31 = vpop.eup %2593 }
 0xa78   :  { %886 = vrot.lane.b32.xlu1 %v2594_v31, %s2801_s23 }
 0xa7a   :  { %v2596_v33 = vpop.eup %2595 }
 0xa7b   :  { %791 = vrot.lane.b32.xlu0 %v2596_v33, %s2801_s23 }
 0xaea   :  { %v887_v35 = vpop.permute.xlu1 %886 }
 0xaeb   :  { %v889_v36 = vmul.f32 %v887_v35, %v871_v17 }
 0xaed   :  { %891 = vrot.lane.b32.xlu0 %v889_v36, %s2802_s24  ;;  %v792_v38 = vpop.permute.xlu0 %791 }
 0xaee   :  { %v3090_v39 = vmul.f32 %v792_v38, %v776_v22 }
 0xaf0   :  { %895 = vrot.lane.b32.xlu1 %v3090_v39, %s2801_s23 }
 0xb5f   :  { %v892_v40 = vpop.permute.xlu0 %891 }
 0xb60   :  { %2256 = vmatmul.mubr.msk.f32.vlgmr.msra.gmra.mrb[6].mxu0 %vm199_vm2, %v892_v40 }
 0xb61   :  { %2470 = vmatpush3.bf16.msra.mxu0 %v2956_v32  ;;  %2274 = vmatprep.mubr.msk.f32.mxu0 %vm2799_vm0, %v2800_v1 }
 0xb62   :  { %2471 = vmatprep.subr.bf16.mxu0 %v2798_v0  ;;  %v896_v42 = vpop.permute.xlu1 %895 }
 0xb63   :  { %v898_v43 = vsel %vm199_vm2, %v892_v40, %v896_v42 }
 0xb64   :  { %2245 = vmatmul.mubr.msk.f32.vlgmr.msra.gmra.mrb[10].mxu1 %vm301_vm3, %v898_v43 }
 0xb65   :  { %2473 = vmatpush3.bf16.msra.mxu0 %v2959_v34  ;;  %2482 = vmatpush3.bf16.msra.mxu1 %v2927_v8 }
 0xb66   :  { %2474 = vmatprep.subr.bf16.mxu0 %v2798_v0  ;;  %2483 = vmatprep.subr.bf16.mxu1 %v2798_v0 }
 0xb67   :  { %2285 = vmatprep.mubr.msk.f32.mxu1 %vm2799_vm0, %v2800_v1 }
 0xb69   :  { %2476 = vmatpush3.bf16.msra.mxu0 %v2963_v37  ;;  %2485 = vmatpush3.bf16.msra.mxu1 %v2931_v11 }
 0xb6a   :  { %2477 = vmatprep.subr.bf16.mxu0 %v2798_v0  ;;  %2486 = vmatprep.subr.bf16.mxu1 %v2798_v0 }
 0xb6d   :  { %2479 = vmatpush3.bf16.msra.mxu0 %v2968_v41 }
 0xb6e   :  { %2498 = vmatprep.subr.bf16.mxu0 %v2798_v0 }
 0xc33   :  { %v1062_v44 = vpop.f32.mrb[6].mxu0 }
 0xc34   :  { %v1066_v45 = vadd.f32 %v1062_v44, %v2948_v15  ;;  %v2257_v47 = vpop.f32.mrb[7].mxu0 }
 0xc36   :  { %2597 = vtanh.f32 %v1066_v45  ;;  %v1067_v53 = vmul.f32 0.5, %v1066_v45 }
 0xc37   :  { %v968_v48 = vpop.f32.mrb[10].mxu1 }
 0xc38   :  { %v969_v49 = vadd.f32 %v2996_v46, %v968_v48  ;;  %v2246_v50 = vpop.f32.mrb[11].mxu1 }
 0xc3a   :  { %2599 = vtanh.f32 %v969_v49  ;;  %v972_v54 = vmul.f32 0.5, %v969_v49 }
 0xc3b   :  { %2601 = vtanh.f32 %v1067_v53 }
 0xc3c   :  { %2603 = vtanh.f32 %v972_v54 }
 0xc40   :  { %v2598_v51 = vpop.eup %2597 }
 0xc41   :  { %1074 = vrot.lane.b32.xlu1 %v2598_v51, %s2801_s23 }
 0xc44   :  { %v2600_v52 = vpop.eup %2599 }
 0xc45   :  { %979 = vrot.lane.b32.xlu0 %v2600_v52, %s2801_s23  ;;  %v2602_v55 = vpop.eup %2601 }
 0xc46   :  { %v1069_v56 = vadd.f32 1.0, %v2602_v55  ;;  %v2604_v57 = vpop.eup %2603 }
 0xc47   :  { %v974_v61 = vadd.f32 1.0, %v2604_v57 }
 0xc48   :  { %v1070_v58 = vmul.f32 0.5, %v1069_v56 }
 0xc49   :  { %v975_v63 = vmul.f32 0.5, %v974_v61 }
 0xc4a   :  { %v1072_v4 = vmul.f32 %v1070_v58, %v3080_v27 }
 0xc4b   :  { %v977_v7 = vmul.f32 %v975_v63, %v3084_v30 }
 0xcb3   :  { %v1075_v60 = vpop.permute.xlu1 %1074 }
 0xcb4   :  { %v1077_v62 = vmul.f32 %v1075_v60, %v1070_v58 }
 0xcb6   :  { %1079 = vrot.lane.b32.xlu1 %v1077_v62, %s2802_s24 }
 0xcb7   :  { %v980_v2 = vpop.permute.xlu0 %979 }
 0xcb8   :  { %v982_v3 = vmul.f32 %v980_v2, %v975_v63 }
 0xcba   :  { %984 = vrot.lane.b32.xlu0 %v982_v3, %s2802_s24 }
 0xd28   :  { %v1080_v5 = vpop.permute.xlu1 %1079 }
 0xd29   :  { %v3120_v6 = vadd.f32 %v1080_v5, %v1072_v4 }
 0xd2b   :  { %2605 = vtanh.f32 %v3120_v6 }
 0xd2c   :  { %v985_v9 = vpop.permute.xlu0 %984 }
 0xd2d   :  { %v3124_v10 = vadd.f32 %v985_v9, %v977_v7 }
 0xd2f   :  { %2607 = vtanh.f32 %v3124_v10 }
 0xd35   :  { %v2606_v12 = vpop.eup %2605 }
 0xd36   :  { %1085 = vrot.lane.b32.xlu1 %v2606_v12, %s2801_s23 }
 0xd39   :  { %v2608_v13 = vpop.eup %2607 }
 0xd3a   :  { %990 = vrot.lane.b32.xlu0 %v2608_v13, %s2801_s23 }
 0xda8   :  { %v1086_v14 = vpop.permute.xlu1 %1085 }
 0xda9   :  { %v1088_v16 = vmul.f32 %v1086_v14, %v1070_v58 }
 0xdab   :  { %1090 = vrot.lane.b32.xlu0 %v1088_v16, %s2802_s24 }
 0xdac   :  { %v991_v17 = vpop.permute.xlu0 %990 }
 0xdad   :  { %v3130_v18 = vmul.f32 %v991_v17, %v975_v63 }
 0xdaf   :  { %1094 = vrot.lane.b32.xlu1 %v3130_v18, %s2801_s23 }
 0xe1d   :  { %v1091_v20 = vpop.permute.xlu0 %1090 }
 0xe1e   :  { %2286 = vmatmul.mubr.msk.f32.vlgmr.msra.gmra.mrb[12].mxu1 %vm199_vm2, %v1091_v20 }
 0xe1f   :  { %2488 = vmatpush3.bf16.msra.mxu1 %v2956_v32  ;;  %2304 = vmatprep.mubr.msk.f32.mxu1 %vm2799_vm0, %v2800_v1 }
 0xe20   :  { %2489 = vmatprep.subr.bf16.mxu1 %v2798_v0 }
 0xe21   :  { %v1095_v21 = vpop.permute.xlu1 %1094 }
 0xe22   :  { %v1097_v22 = vsel %vm199_vm2, %v1091_v20, %v1095_v21 }
 0xe23   :  { %2491 = vmatpush3.bf16.msra.mxu1 %v2959_v34  ;;  %2275 = vmatmul.mubr.msk.f32.vlgmr.msra.gmra.mrb[8].mxu0 %vm301_vm3, %v1097_v22 }
 0xe24   :  { %2492 = vmatprep.subr.bf16.mxu1 %v2798_v0  ;;  %2500 = vmatpush3.bf16.msra.mxu0 %v2927_v8 }
 0xe25   :  { %2315 = vmatprep.mubr.msk.f32.mxu0 %vm2799_vm0, %v2800_v1  ;;  %2501 = vmatprep.subr.bf16.mxu0 %v2798_v0 }
 0xe27   :  { %2494 = vmatpush3.bf16.msra.mxu1 %v2963_v37 }
 0xe28   :  { %2495 = vmatprep.subr.bf16.mxu1 %v2798_v0  ;;  %2503 = vmatpush3.bf16.msra.mxu0 %v2931_v11 }
 0xe29   :  { %2504 = vmatprep.subr.bf16.mxu0 %v2798_v0 }
 0xe2b   :  { %2497 = vmatpush3.bf16.msra.mxu1 %v2968_v41 }
 0xe2c   :  { %2516 = vmatprep.subr.bf16.mxu1 %v2798_v0 }
 0xef1   :  { %v1261_v23 = vpop.f32.mrb[12].mxu1 }
 0xef2   :  { %v1265_v24 = vadd.f32 %v1261_v23, %v2948_v15  ;;  %v2287_v25 = vpop.f32.mrb[13].mxu1 }
 0xef4   :  { %2609 = vtanh.f32 %v1265_v24  ;;  %v1266_v31 = vmul.f32 0.5, %v1265_v24 }
 0xef6   :  { %v1167_v26 = vpop.f32.mrb[8].mxu0 }
 0xef7   :  { %v1168_v27 = vadd.f32 %v2996_v46, %v1167_v26  ;;  %v2276_v28 = vpop.f32.mrb[9].mxu0 }
 0xef9   :  { %2611 = vtanh.f32 %v1168_v27  ;;  %v1171_v33 = vmul.f32 0.5, %v1168_v27 }
 0xefa   :  { %2613 = vtanh.f32 %v1266_v31 }
 0xefb   :  { %2615 = vtanh.f32 %v1171_v33 }
 0xefe   :  { %v2610_v29 = vpop.eup %2609 }
 0xeff   :  { %1273 = vrot.lane.b32.xlu1 %v2610_v29, %s2801_s23 }
 0xf03   :  { %v2612_v30 = vpop.eup %2611 }
 0xf04   :  { %1178 = vrot.lane.b32.xlu0 %v2612_v30, %s2801_s23  ;;  %v2614_v35 = vpop.eup %2613 }
 0xf05   :  { %v1268_v36 = vadd.f32 1.0, %v2614_v35  ;;  %v2616_v38 = vpop.eup %2615 }
 0xf06   :  { %v1173_v44 = vadd.f32 1.0, %v2616_v38 }
 0xf07   :  { %v1269_v40 = vmul.f32 0.5, %v1268_v36 }
 0xf08   :  { %v1174_v45 = vmul.f32 0.5, %v1173_v44 }
 0xf09   :  { %v1271_v49 = vmul.f32 %v1269_v40, %v3120_v6 }
 0xf0a   :  { %v1176_v52 = vmul.f32 %v1174_v45, %v3124_v10 }
 0xf71   :  { %v1274_v42 = vpop.permute.xlu1 %1273 }
 0xf72   :  { %v1276_v43 = vmul.f32 %v1274_v42, %v1269_v40 }
 0xf74   :  { %1278 = vrot.lane.b32.xlu1 %v1276_v43, %s2802_s24 }
 0xf76   :  { %v1179_v47 = vpop.permute.xlu0 %1178 }
 0xf77   :  { %v1181_v48 = vmul.f32 %v1179_v47, %v1174_v45 }
 0xf79   :  { %1183 = vrot.lane.b32.xlu0 %v1181_v48, %s2802_s24 }
 0xfe6   :  { %v1279_v50 = vpop.permute.xlu1 %1278 }
 0xfe7   :  { %v1281_v51 = vadd.f32 %v1279_v50, %v1271_v49 }
 0xfe9   :  { %2617 = vtanh.f32 %v1281_v51 }
 0xfeb   :  { %v1184_v53 = vpop.permute.xlu0 %1183 }
 0xfec   :  { %v1186_v54 = vadd.f32 %v1184_v53, %v1176_v52 }
 0xfee   :  { %2619 = vtanh.f32 %v1186_v54 }
 0xff3   :  { %v2618_v55 = vpop.eup %2617 }
 0xff4   :  { %1284 = vrot.lane.b32.xlu1 %v2618_v55, %s2801_s23 }
 0xff8   :  { %v2620_v56 = vpop.eup %2619 }
 0xff9   :  { %1189 = vrot.lane.b32.xlu0 %v2620_v56, %s2801_s23 }
0x1066   :  { %v1285_v57 = vpop.permute.xlu1 %1284 }
0x1067   :  { %v1287_v58 = vmul.f32 %v1285_v57, %v1269_v40 }
0x1069   :  { %1289 = vrot.lane.b32.xlu0 %v1287_v58, %s2802_s24 }
0x106b   :  { %v1190_v60 = vpop.permute.xlu0 %1189 }
0x106c   :  { %v3164_v61 = vmul.f32 %v1190_v60, %v1174_v45 }
0x106e   :  { %1293 = vrot.lane.b32.xlu1 %v3164_v61, %s2801_s23 }
0x10db   :  { %v1290_v62 = vpop.permute.xlu0 %1289 }
0x10dc   :  { %2316 = vmatmul.mubr.msk.f32.vlgmr.msra.gmra.mrb[10].mxu0 %vm199_vm2, %v1290_v62 }
0x10dd   :  { %2506 = vmatpush3.bf16.msra.mxu0 %v2956_v32  ;;  %2334 = vmatprep.mubr.msk.f32.mxu0 %vm2799_vm0, %v2800_v1 }
0x10de   :  { %2507 = vmatprep.subr.bf16.mxu0 %v2798_v0 }
0x10e0   :  { %v1294_v63 = vpop.permute.xlu1 %1293 }
0x10e1   :  { %2509 = vmatpush3.bf16.msra.mxu0 %v2959_v34  ;;  %v1296_v2 = vsel %vm199_vm2, %v1290_v62, %v1294_v63 }
0x10e2   :  { %2510 = vmatprep.subr.bf16.mxu0 %v2798_v0  ;;  %2305 = vmatmul.mubr.msk.f32.vlgmr.msra.gmra.mrb[14].mxu1 %vm301_vm3, %v1296_v2 }
0x10e3   :  { %2518 = vmatpush3.bf16.msra.mxu1 %v2927_v8  ;;  %2345 = vmatprep.mubr.msk.f32.mxu1 %vm2799_vm0, %v2800_v1 }
0x10e4   :  { %2519 = vmatprep.subr.bf16.mxu1 %v2798_v0 }
0x10e5   :  { %2512 = vmatpush3.bf16.msra.mxu0 %v2963_v37 }
0x10e6   :  { %2513 = vmatprep.subr.bf16.mxu0 %v2798_v0 }
0x10e7   :  { %2521 = vmatpush3.bf16.msra.mxu1 %v2931_v11 }
0x10e8   :  { %2522 = vmatprep.subr.bf16.mxu1 %v2798_v0 }
0x10e9   :  { %2515 = vmatpush3.bf16.msra.mxu0 %v2968_v41 }
0x11af   :  { %v1460_v3 = vpop.f32.mrb[10].mxu0 }
0x11b0   :  { %v1464_v4 = vadd.f32 %v1460_v3, %v2948_v15  ;;  %v2317_v5 = vpop.f32.mrb[11].mxu0 }
0x11b2   :  { %2621 = vtanh.f32 %v1464_v4  ;;  %v1465_v11 = vmul.f32 0.5, %v1464_v4 }
0x11b5   :  { %v1366_v8 = vpop.f32.mrb[14].mxu1 }
0x11b6   :  { %v1367_v6 = vadd.f32 %v2996_v46, %v1366_v8  ;;  %v2306_v7 = vpop.f32.mrb[15].mxu1 }
0x11b8   :  { %2623 = vtanh.f32 %v1367_v6  ;;  %v1370_v12 = vmul.f32 0.5, %v1367_v6 }
0x11b9   :  { %2625 = vtanh.f32 %v1465_v11 }
0x11ba   :  { %2627 = vtanh.f32 %v1370_v12 }
0x11bc   :  { %v2622_v9 = vpop.eup %2621 }
0x11bd   :  { %1472 = vrot.lane.b32.xlu1 %v2622_v9, %s2801_s23 }
0x11c2   :  { %v2624_v10 = vpop.eup %2623 }
0x11c3   :  { %1377 = vrot.lane.b32.xlu0 %v2624_v10, %s2801_s23  ;;  %v2626_v13 = vpop.eup %2625 }
0x11c4   :  { %v1467_v14 = vadd.f32 1.0, %v2626_v13  ;;  %v2628_v16 = vpop.eup %2627 }
0x11c5   :  { %v1372_v22 = vadd.f32 1.0, %v2628_v16 }
0x11c6   :  { %v1468_v17 = vmul.f32 0.5, %v1467_v14 }
0x11c7   :  { %v1373_v23 = vmul.f32 0.5, %v1372_v22 }
0x11c8   :  { %v1470_v26 = vmul.f32 %v1468_v17, %v1281_v51 }
0x11c9   :  { %v1375_v29 = vmul.f32 %v1373_v23, %v1186_v54 }
0x122f   :  { %v1473_v20 = vpop.permute.xlu1 %1472 }
0x1230   :  { %v1475_v21 = vmul.f32 %v1473_v20, %v1468_v17 }
0x1232   :  { %1477 = vrot.lane.b32.xlu1 %v1475_v21, %s2802_s24 }
0x1235   :  { %v1378_v24 = vpop.permute.xlu0 %1377 }
0x1236   :  { %v1380_v25 = vmul.f32 %v1378_v24, %v1373_v23 }
0x1238   :  { %1382 = vrot.lane.b32.xlu0 %v1380_v25, %s2802_s24 }
0x12a4   :  { %v1478_v27 = vpop.permute.xlu1 %1477 }
0x12a5   :  { %v1480_v28 = vadd.f32 %v1478_v27, %v1470_v26 }
0x12a7   :  { %2629 = vtanh.f32 %v1480_v28 }
0x12aa   :  { %v1383_v30 = vpop.permute.xlu0 %1382 }
0x12ab   :  { %v1385_v31 = vadd.f32 %v1383_v30, %v1375_v29  ;;  %v1792_v30 = vld [vmem:[#allocation10 + $0x10] sm:$0xff] }
0x12ad   :  { %2631 = vtanh.f32 %v1385_v31 }
0x12b1   :  { %v2630_v33 = vpop.eup %2629 }
0x12b2   :  { %1483 = vrot.lane.b32.xlu1 %v2630_v33, %s2801_s23 }
0x12b7   :  { %v2632_v35 = vpop.eup %2631 }
0x12b8   :  { %1388 = vrot.lane.b32.xlu0 %v2632_v35, %s2801_s23 }
0x1324   :  { %v1484_v36 = vpop.permute.xlu1 %1483 }
0x1325   :  { %v1486_v38 = vmul.f32 %v1484_v36, %v1468_v17 }
0x1327   :  { %1488 = vrot.lane.b32.xlu0 %v1486_v38, %s2802_s24 }
0x132a   :  { %v1389_v40 = vpop.permute.xlu0 %1388 }
0x132b   :  { %v3195_v42 = vmul.f32 %v1389_v40, %v1373_v23 }
0x132d   :  { %1492 = vrot.lane.b32.xlu1 %v3195_v42, %s2801_s23 }
0x1399   :  { %v1489_v43 = vpop.permute.xlu0 %1488 }
0x139a   :  { %2346 = vmatmul.mubr.msk.f32.vlgmr.msra.gmra.mrb[16].mxu1 %vm199_vm2, %v1489_v43 }
0x139b   :  { %2524 = vmatpush3.bf16.msra.mxu1 %v2956_v32  ;;  %2364 = vmatprep.mubr.msk.f32.mxu1 %vm2799_vm0, %v2800_v1 }
0x139c   :  { %2525 = vmatprep.subr.bf16.mxu1 %v2798_v0 }
0x139f   :  { %2527 = vmatpush3.bf16.msra.mxu1 %v2959_v34  ;;  %v1493_v44 = vpop.permute.xlu1 %1492 }
0x13a0   :  { %2528 = vmatprep.subr.bf16.mxu1 %v2798_v0  ;;  %v1495_v45 = vsel %vm199_vm2, %v1489_v43, %v1493_v44 }
0x13a1   :  { %2335 = vmatmul.mubr.msk.f32.vlgmr.msra.gmra.mrb[12].mxu0 %vm301_vm3, %v1495_v45 }
0x13a3   :  { %2530 = vmatpush3.bf16.msra.mxu1 %v2963_v37 }
0x13a4   :  { %2531 = vmatprep.subr.bf16.mxu1 %v2798_v0 }
0x13a7   :  { %2533 = vmatpush3.bf16.msra.mxu1 %v2968_v41 }
0x146d   :  { %v1659_v32 = vpop.f32.mrb[16].mxu1 }
0x146e   :  { %v1663_v1 = vadd.f32 %v1659_v32, %v2948_v15  ;;  %v2347_v47 = vpop.f32.mrb[17].mxu1 }
0x1470   :  { %2633 = vtanh.f32 %v1663_v1  ;;  %v1664_v37 = vmul.f32 0.5, %v1663_v1  ;;  %v1984_v1 = vld [vmem:[%s3274_s7] ss:$0 sm:$0xff]  ;;  %s1952_s7 = sshll.u32 %s2803_s27, 4  ;;  %s1953_s7 = int_to_ptr.vmem [resolvable:$true] %s1952_s7 }
0x1471   :  { %s2761_s29 = scalar_lea.vmem %s1953_s7, 1024  ;;  %p2766_p13 = scmp.lt.s32.totalorder %s1953_s7, %s1953_s7 }
0x1472   :  { %p2762_p12 = scmp.ne.s32.totalorder %s1953_s7, %s2761_s29  ;;  %p2767_p0 = scmp.lt.s32.totalorder %s2761_s29, %s2761_s29 }
0x1474   :  { %v1565_v48 = vpop.f32.mrb[12].mxu0  ;;  %p2768_p1 = por %p2767_p0, %p2766_p13 }
0x1475   :  { %v1566_v34 = vadd.f32 %v2996_v46, %v1565_v48  ;;  %v2336_v49 = vpop.f32.mrb[13].mxu0 }
0x1476   :  { %p2769_p2 = pnand %p2768_p1, %p2762_p12 }
0x1477   :  { %2635 = vtanh.f32 %v1566_v34  ;;  %v1569_v0 = vmul.f32 0.5, %v1566_v34 }
0x1478   :  { %2637 = vtanh.f32 %v1664_v37 }
0x1479   :  { %2639 = vtanh.f32 %v1569_v0 }
0x147a   :  { %v2634_v50 = vpop.eup %2633 }
0x147b   :  { %1671 = vrot.lane.b32.xlu1 %v2634_v50, %s2801_s23 }
0x1481   :  { %v2636_v51 = vpop.eup %2635 }
0x1482   :  { %1576 = vrot.lane.b32.xlu0 %v2636_v51, %s2801_s23  ;;  %v2638_v41 = vpop.eup %2637 }
0x1483   :  { %v1666_v52 = vadd.f32 1.0, %v2638_v41  ;;  %v2640_v53 = vpop.eup %2639 }
0x1484   :  { %v1571_v56 = vadd.f32 1.0, %v2640_v53 }
0x1485   :  { %v1667_v15 = vmul.f32 0.5, %v1666_v52 }
0x1486   :  { %v1572_v57 = vmul.f32 0.5, %v1571_v56 }
0x1487   :  { %v1669_v62 = vmul.f32 %v1667_v15, %v1480_v28  ;;  %v1791_v28 = vld [vmem:[#allocation10 + $0x8] sm:$0xff] }
0x1488   :  { %v1574_v3 = vmul.f32 %v1572_v57, %v1385_v31  ;;  %v1793_v31 = vld [vmem:[#allocation10 + $0x18] sm:$0xff] }
0x1489   :  { %v2538_v35 = vpack.c.bf16 %v1793_v31, %v1792_v30 }
0x14ed   :  { %v1672_v54 = vpop.permute.xlu1 %1671 }
0x14ee   :  { %v1674_v55 = vmul.f32 %v1672_v54, %v1667_v15 }
0x14f0   :  { %1676 = vrot.lane.b32.xlu1 %v1674_v55, %s2802_s24 }
0x14f4   :  { %v1577_v58 = vpop.permute.xlu0 %1576 }
0x14f5   :  { %v1579_v60 = vmul.f32 %v1577_v58, %v1572_v57 }
0x14f7   :  { %1581 = vrot.lane.b32.xlu0 %v1579_v60, %s2802_s24 }
0x1562   :  { %v1677_v63 = vpop.permute.xlu1 %1676 }
0x1563   :  { %v1679_v2 = vadd.f32 %v1677_v63, %v1669_v62 }
0x1565   :  { %2641 = vtanh.f32 %v1679_v2 }
0x1569   :  { %v1582_v4 = vpop.permute.xlu0 %1581 }
0x156a   :  { %v1584_v5 = vadd.f32 %v1582_v4, %v1574_v3 }
0x156c   :  { %2643 = vtanh.f32 %v1584_v5 }
0x156f   :  { %v2642_v8 = vpop.eup %2641 }
0x1570   :  { %1682 = vrot.lane.b32.xlu1 %v2642_v8, %s2801_s23 }
0x1576   :  { %v2644_v6 = vpop.eup %2643 }
0x1577   :  { %1587 = vrot.lane.b32.xlu0 %v2644_v6, %s2801_s23 }
0x15e2   :  { %v1683_v7 = vpop.permute.xlu1 %1682 }
0x15e3   :  { %v1685_v9 = vmul.f32 %v1683_v7, %v1667_v15 }
0x15e5   :  { %1687 = vrot.lane.b32.xlu0 %v1685_v9, %s2802_s24 }
0x15e9   :  { %v1588_v10 = vpop.permute.xlu0 %1587 }
0x15ea   :  { %v1590_v11 = vmul.f32 %v1588_v10, %v1572_v57 }
0x15ec   :  { %1691 = vrot.lane.b32.xlu1 %v1590_v11, %s2801_s23 }
0x1657   :  { %v1688_v12 = vpop.permute.xlu0 %1687 }
0x165e   :  { %v1692_v13 = vpop.permute.xlu1 %1691 }
0x165f   :  { %v1694_v14 = vsel %vm199_vm2, %v1688_v12, %v1692_v13 }
0x1660   :  { %2365 = vmatmul.mubr.msk.f32.vlgmr.msra.gmra.mrb[18].mxu1 %vm301_vm3, %v1694_v14 }
0x1733   :  { %v1764_v16 = vpop.f32.mrb[18].mxu1 }
0x1734   :  { %v1765_v17 = vadd.f32 %v2996_v46, %v1764_v16  ;;  %v2366_v20 = vpop.f32.mrb[19].mxu1  ;;  %v1790_v46 = vld [vmem:[#allocation10] sm:$0xff] }
0x1735   :  { %v2534_v29 = vpack.c.bf16 %v1791_v28, %v1790_v46 }
0x1736   :  { %2645 = vtanh.f32 %v1765_v17  ;;  %v1768_v22 = vmul.f32 0.5, %v1765_v17 }
0x1737   :  { %2535 = vmatprep.subr.bf16.mxu0 %v2534_v29 }
0x1738   :  { %2647 = vtanh.f32 %v1768_v22  ;;  %2537 = vmatpush3.bf16.msra.mxu0 %v2534_v29 }
0x1739   :  { %2539 = vmatprep.subr.bf16.mxu0 %v2538_v35 }
0x173c   :  { %2541 = vmatpush3.bf16.msra.mxu0 %v2538_v35 }
0x1740   :  { %v2646_v21 = vpop.eup %2645 }
0x1741   :  { %1775 = vrot.lane.b32.xlu0 %v2646_v21, %s2801_s23 }
0x1742   :  { %v2648_v23 = vpop.eup %2647 }
0x1743   :  { %v1770_v24 = vadd.f32 1.0, %v2648_v23 }
0x1745   :  { %v1771_v25 = vmul.f32 0.5, %v1770_v24 }
0x1747   :  { %v1773_v33 = vmul.f32 %v1771_v25, %v1584_v5 }
0x17b3   :  { %v1776_v26 = vpop.permute.xlu0 %1775 }
0x17b4   :  { %v1778_v27 = vmul.f32 %v1776_v26, %v1771_v25 }
0x17b6   :  { %1780 = vrot.lane.b32.xlu1 %v1778_v27, %s2802_s24 }
0x17ba   :  { %1802 = vrot.lane.b32.xlu1 %v3010_v19, %s2802_s24 }
0x17be   :  { %1806 = vrot.lane.b32.xlu1 %v3090_v39, %s2802_s24 }
0x17c2   :  { %1810 = vrot.lane.b32.xlu1 %v3164_v61, %s2802_s24 }
0x17c6   :  { %1814 = vrot.lane.b32.xlu1 %v1590_v11, %s2802_s24 }
0x1828   :  { %v1781_v36 = vpop.permute.xlu1 %1780 }
0x1829   :  { %v1783_v38 = vadd.f32 %v1781_v36, %v1773_v33 }
0x182b   :  { %2649 = vtanh.f32 %v1783_v38 }
0x182c   :  { %v1803_v19 = vpop.permute.xlu1 %1802 }
0x182d   :  { %2375 = vmatprep.mubr.msk.f32.mxu0 %vm199_vm2, %v1803_v19 }
0x1830   :  { %v1807_v40 = vpop.permute.xlu1 %1806 }
0x1834   :  { %v1811_v45 = vpop.permute.xlu1 %1810 }
0x1835   :  { %v2650_v39 = vpop.eup %2649 }
0x1836   :  { %1786 = vrot.lane.b32.xlu0 %v2650_v39, %s2801_s23 }
0x183a   :  { %1804 = vrot.lane.b32.xlu0 %v3050_v59, %s2802_s24 }
0x183e   :  { %1808 = vrot.lane.b32.xlu0 %v3130_v18, %s2802_s24  ;;  %v1815_v18 = vpop.permute.xlu1 %1814 }
0x1842   :  { %1812 = vrot.lane.b32.xlu0 %v3195_v42, %s2802_s24 }
0x18a8   :  { %v1787_v61 = vpop.permute.xlu0 %1786 }
0x18a9   :  { %v1789_v43 = vmul.f32 %v1787_v61, %v1771_v25 }
0x18ab   :  { %1816 = vrot.lane.b32.xlu0 %v1789_v43, %s2802_s24 }
0x18ac   :  { %v1805_v44 = vpop.permute.xlu0 %1804 }
0x18ad   :  { %2376 = vmatmul.mubr.msk.f32.vlgmr.msra.gmra.mrb[14].mxu0 %vm199_vm2, %v1805_v44 }
0x18ae   :  { %2378 = vmatprep.mubr.msk.f32.mxu0 %vm199_vm2, %v1807_v40 }
0x18b0   :  { %v1809_v32 = vpop.permute.xlu0 %1808 }
0x18b1   :  { %2379 = vmatmul.mubr.msk.f32.gmra.mrb[16].mxu0 %vm199_vm2, %v1809_v32 }
0x18b2   :  { %2381 = vmatprep.mubr.msk.f32.mxu0 %vm199_vm2, %v1811_v45 }
0x18b4   :  { %v1813_v59 = vpop.permute.xlu0 %1812 }
0x18b5   :  { %2382 = vmatmul.mubr.msk.f32.gmra.mrb[18].mxu0 %vm199_vm2, %v1813_v59 }
0x18b6   :  { %2384 = vmatprep.mubr.msk.f32.mxu0 %vm199_vm2, %v1815_v18 }
0x191d   :  { %v1817_v42 = vpop.permute.xlu0 %1816 }
0x191e   :  { %2385 = vmatmul.mubr.msk.f32.gmra.mrb[20].mxu0 %vm199_vm2, %v1817_v42 }
0x1980   :  { %v2377_v47 = vpop.f32.mrb[14].mxu0 }
0x1981   :  { %v1906_v48 = vadd.f32 %v2377_v47, %v1984_v1  ;;  %v1900_v34 = vpop.f32.mrb[15].mxu0 }
0x1982   :  { %v1901_v49 = vadd.f32 %v1984_v1, %v1900_v34 }
0x1983   :  { %1940 = vst [vmem:[#allocation11 + $0x8] sm:$0xff] %v1906_v48 }
0x1984   :  { %1939 = vst [vmem:[#allocation11] sm:$0xff] %v1901_v49  ;;  %v2380_v50 = vpop.f32.mrb[16].mxu0 }
0x1985   :  { %v1916_v51 = vadd.f32 %v2380_v50, %v1984_v1  ;;  %v1910_v37 = vpop.f32.mrb[17].mxu0 }
0x1986   :  { %v1911_v0 = vadd.f32 %v1984_v1, %v1910_v37 }
0x1987   :  { %1942 = vst [vmem:[#allocation11 + $0x18] sm:$0xff] %v1916_v51 }
0x1988   :  { %1941 = vst [vmem:[#allocation11 + $0x10] sm:$0xff] %v1911_v0  ;;  %v2383_v41 = vpop.f32.mrb[18].mxu0 }
0x1989   :  { %v1926_v52 = vadd.f32 %v2383_v41, %v1984_v1  ;;  %v1920_v15 = vpop.f32.mrb[19].mxu0 }
0x198a   :  { %v1921_v53 = vadd.f32 %v1984_v1, %v1920_v15 }
0x198b   :  { %1944 = vst [vmem:[#allocation11 + $0x28] sm:$0xff] %v1926_v52 }
0x198c   :  { %1943 = vst [vmem:[#allocation11 + $0x20] sm:$0xff] %v1921_v53 }
0x19f1   :  { %v2386_v54 = vpop.f32.mrb[20].mxu0 }
0x19f2   :  { %v1936_v55 = vadd.f32 %v2386_v54, %v1984_v1  ;;  %v1930_v56 = vpop.f32.mrb[21].mxu0 }
0x19f3   :  { %v1931_v57 = vadd.f32 %v1984_v1, %v1930_v56 }
0x19f4   :  { %1946 = vst [vmem:[#allocation11 + $0x38] sm:$0xff] %v1936_v55 }
0x19f5   :  { %1945 = vst [vmem:[#allocation11 + $0x30] sm:$0xff] %v1931_v57 }
0x19f6   :  { %2772 = shalt.err (!%p2769_p2)
}
0x19f7   :  { %s2773_s28 = scalar_lea.hbm %s3275_s8, 1024 }
0x19f8   :  { %p2774_p3 = scmp.ne.s32.totalorder %s3275_s8, %s2773_s28  ;;  %p2777_p4 = scmp.lt.u32.totalorder %s2773_s28, %s3275_s8 }
0x19fa   :  { %p2779_p5 = pnand %p2777_p4, %p2774_p3 }
0x19fc   :  { %2782 = shalt.err (!%p2779_p5)
}
0x19fd   :  { %1958 = dma.vmem_to_hbm [thread:$0]  %s1953_s7, 1024, %s3275_s8, [#allocation4], %s2792_s15, %s2792_s15, %s2793_s16  }
0x19fe   :  { %2789 = dma.done.wait [#allocation4], 1024  }
0x19ff   :  { %2790 = vsyncadd [#allocation4], 4294966272 }
0x1a00   :  { %1962 = vsyncpa [#allocation3], 1 }
0x1a01   :  { %1963 = vsyncpa [#allocation6], 1 }
0x1a02   :  { %1964 = vsyncpa [#allocation9], 1 }
0x1a03   :  { %1965 = vsyncpa [#allocation4], 1 }

</bundles_post_ra>
